<compile_context>
chip_gen: v7x
topology: tpu7x:2x2x1
jax: 0.10.0
libtpu: 0.0.40
codegen_flags: <defaults>
</compile_context>

<pallas_src>
import functools

import jax
import jax.numpy as jnp
import numpy as np
from jax.experimental import pallas as pl
from jax.experimental.pallas import tpu as pltpu

K = 4  # number of nearest neighbours (self.k)


def _leaky(x):
    return jnp.where(x > 0, x, 0.2 * x)


def _pick_tm(n):
    # Query-row tile: multiple of 8 (sublane layout), capped at 256 so the
    # ~6-8 live [TM, N] f32 buffers stay well inside VMEM on v7x (64 MiB) as
    # well as v5e/v6e.
    for tm in (256, 128, 64, 32, 16, 8):
        if n % tm == 0:
            return tm
    return n  # fall back to a single full-row tile (block == full dim)


def _knn_dist_kernel(v_ref, vq_ref, f_ref, w1_ref, b1_ref, w2_ref, b2_ref,
                     w3_ref, b3_ref, o_ref, *, k):
    f32 = jnp.float32

    V = v_ref[0]      # [N, 3]    all vertices of this batch element
    Vq = vq_ref[0]    # [TM, 3]   query-row vertices of this tile
    Fm = f_ref[0]     # [N, Cp]   features of this batch element
    N = V.shape[0]
    TM = Vq.shape[0]

    # --- square_distance: D[m, n] = ||Vq_m - V_n||^2 -------------------------
    G = jnp.einsum('md,nd->mn', Vq, V, preferred_element_type=f32)          # [TM, N]
    row_sq = jnp.sum(Vq * Vq, axis=1, keepdims=True)                        # [TM, 1]
    col_sq = jnp.einsum('od,nd->on', jnp.ones((1, 3), f32), V * V,
                        preferred_element_type=f32)                         # [1, N]
    D = row_sq + col_sq - 2.0 * G                                           # [TM, N]

    lane = jax.lax.broadcasted_iota(jnp.int32, (1, N), 1)                   # [1, N]

    # --- knn: iterative masked arg-min (tie-break toward smaller index) ------
    Dwork = D
    amins = []
    vjs = []
    for j in range(k):
        mval = jnp.min(Dwork, axis=1, keepdims=True)                        # [TM, 1]
        cand = jnp.where(Dwork <= mval, lane, N)                            # [TM, N]
        amin = jnp.min(cand, axis=1, keepdims=True)                         # [TM, 1]
        sel = lane == amin                                                  # [TM, N]
        Dwork = jnp.where(sel, f32(jnp.inf), Dwork)
        amins.append(amin)
        if j > 0:
            # gather neighbour-j coordinates: vj[m, :] = V[id[m, j], :]
            vjs.append(jnp.dot(sel.astype(f32), V,
                               preferred_element_type=f32))                 # [TM, 3]

    # --- relation features; j == 0 neighbour is the query point itself -------
    z3 = jnp.zeros((TM, 3), f32)
    z1 = jnp.zeros((TM, 1), f32)
    feat_blocks = [jnp.concatenate([Vq, Vq, z3, z1], axis=1)]               # [TM, 10]
    for vj in vjs:
        diff = Vq - vj
        nrm = jnp.sqrt(jnp.sum(diff * diff, axis=1, keepdims=True))         # [TM, 1]
        feat_blocks.append(jnp.concatenate([Vq, vj, diff, nrm], axis=1))
    feat_all = jnp.concatenate(feat_blocks, axis=0)                         # [k*TM, 10]

    # --- self.R (Linear 10->10 -> LeakyReLU -> 10->10 -> LeakyReLU -> 10->1),
    #     batched once over all k neighbours ---------------------------------
    h = _leaky(jnp.dot(feat_all, w1_ref[...], preferred_element_type=f32) + b1_ref[...])
    h = _leaky(jnp.dot(h, w2_ref[...], preferred_element_type=f32) + b2_ref[...])
    w_all = jnp.dot(h, w3_ref[...], preferred_element_type=f32) + b3_ref[...]   # [k*TM, 1]

    # --- weighted adjacency via selects (selected lanes are disjoint over j) -
    acc = jnp.zeros((TM, N), f32)
    for j in range(k):
        wj = w_all[j * TM:(j + 1) * TM]                                     # [TM, 1]
        sel = lane == amins[j]
        acc = jnp.where(sel, wj, acc)

    # --- weighted sum over neighbours: out[m, c] = sum_j w[m,j] * F[id[m,j], c]
    o_ref[0] = jnp.dot(acc, Fm, preferred_element_type=f32)                 # [TM, Cp]


def knn_dist_forward(feats, verts, params, *, k=K):
    """feats: [B, N, C] f32, verts: [B, N, 3] f32 -> [B, N, 1, C] f32."""
    B, N, C = feats.shape
    W1, b1, W2, b2, W3, b3 = params

    # Lane-dense output: pad channels up to a multiple of 128 (sliced back).
    Cp = ((C + 127) // 128) * 128
    feats_p = feats if Cp == C else jnp.pad(feats, ((0, 0), (0, 0), (0, Cp - C)))

    TM = _pick_tm(N)
    grid = (B, N // TM)

    out = pl.pallas_call(
        functools.partial(_knn_dist_kernel, k=k),
        out_shape=jax.ShapeDtypeStruct((B, N, Cp), jnp.float32),
        grid_spec=pltpu.PrefetchScalarGridSpec(
            num_scalar_prefetch=0,
            grid=grid,
            in_specs=[
                # full vertex table (row-invariant: resident per batch element)
                pl.BlockSpec((1, N, 3), lambda b, r: (b, 0, 0)),
                # query-row vertex tile
                pl.BlockSpec((1, TM, 3), lambda b, r: (b, r, 0)),
                # full feature table (row-invariant)
                pl.BlockSpec((1, N, Cp), lambda b, r: (b, 0, 0)),
                # MLP parameters (tiny, full blocks)
                pl.BlockSpec((10, 10), lambda b, r: (0, 0)),
                pl.BlockSpec((1, 10), lambda b, r: (0, 0)),
                pl.BlockSpec((10, 10), lambda b, r: (0, 0)),
                pl.BlockSpec((1, 10), lambda b, r: (0, 0)),
                pl.BlockSpec((10, 1), lambda b, r: (0, 0)),
                pl.BlockSpec((1, 1), lambda b, r: (0, 0)),
            ],
            out_specs=pl.BlockSpec((1, TM, Cp), lambda b, r: (b, r, 0)),
        ),
        compiler_params=pltpu.CompilerParams(
            # batch and row-tile axes are fully independent -> megacore on v7x
            dimension_semantics=("parallel", "parallel"),
            # above the 16/32 MiB scoped defaults, below v7x's 64 MiB physical
            vmem_limit_bytes=48 * 1024 * 1024,
        ),
    )(verts, verts, feats_p, W1, b1, W2, b2, W3, b3)

    out = out[..., :C]
    return out[:, :, None, :]


# ----------------------------- pure-JAX reference -----------------------------
def _ref_forward(feats, verts, params, k):
    W1, b1, W2, b2, W3, b3 = params
    g = jnp.einsum('bnd,bmd->bnm', verts, verts)
    sq = jnp.sum(verts * verts, axis=-1)
    dist = sq[:, :, None] + sq[:, None, :] - 2.0 * g          # symmetric
    idx = jax.lax.top_k(-dist, k)[1]                          # [B, N, k]
    v = jax.vmap(lambda vb, ib: vb[ib])(verts, idx)           # [B, N, k, 3]
    f = jax.vmap(lambda fb, ib: fb[ib])(feats, idx)           # [B, N, k, C]
    v0 = jnp.broadcast_to(v[:, :, :1, :], v.shape)
    diff = v0 - v
    nrm = jnp.sqrt(jnp.sum(diff * diff, axis=-1, keepdims=True))
    vF = jnp.concatenate([v0, v, diff, nrm], axis=-1)          # [B, N, k, 10]
    h = _leaky(vF @ W1 + b1[0])
    h = _leaky(h @ W2 + b2[0])
    w = h @ W3 + b3[0]                                         # [B, N, k, 1]
    out = jnp.sum(w * f, axis=2)                               # [B, N, C]
    return out[:, :, None, :]


def _make_params(key):
    k1, k2, k3, k4, k5, k6 = jax.random.split(key, 6)
    W1 = 0.3 * jax.random.normal(k1, (10, 10), dtype=jnp.float32)
    b1 = 0.1 * jax.random.normal(k2, (1, 10), dtype=jnp.float32)
    W2 = 0.3 * jax.random.normal(k3, (10, 10), dtype=jnp.float32)
    b2 = 0.1 * jax.random.normal(k4, (1, 10), dtype=jnp.float32)
    W3 = 0.3 * jax.random.normal(k5, (10, 1), dtype=jnp.float32)
    b3 = 0.1 * jax.random.normal(k6, (1, 1), dtype=jnp.float32)
    return (W1, b1, W2, b2, W3, b3)


if __name__ == "__main__":
    key = jax.random.PRNGKey(0)
    kp, kv, kf, kv2, kf2 = jax.random.split(key, 5)
    params = _make_params(kp)

    # Small test (matches the module's use: per-point features, 3-D vertices).
    B, N, C = 2, 16, 32
    verts = jax.random.normal(kv, (B, N, 3), dtype=jnp.float32)
    feats = jax.random.normal(kf, (B, N, C), dtype=jnp.float32)
    out = jax.block_until_ready(knn_dist_forward(feats, verts, params))
    ref = jax.block_until_ready(_ref_forward(feats, verts, params, K))
    np.testing.assert_allclose(np.asarray(out), np.asarray(ref), rtol=1e-4, atol=1e-4)

    # Second check exercising the multi-row-tile path (N // TM > 1).
    B2, N2, C2 = 1, 512, 32
    verts2 = jax.random.normal(kv2, (B2, N2, 3), dtype=jnp.float32)
    feats2 = jax.random.normal(kf2, (B2, N2, C2), dtype=jnp.float32)
    out2 = jax.block_until_ready(knn_dist_forward(feats2, verts2, params))
    ref2 = jax.block_until_ready(_ref_forward(feats2, verts2, params, K))
    np.testing.assert_allclose(np.asarray(out2), np.asarray(ref2), rtol=1e-4, atol=1e-4)

    print("KERNEL_OK")
</pallas_src>

<mosaic_0001>
module attributes {stable_mosaic.version = 11 : i64} {
  func.func @_knn_dist_kernel(%arg0: i32, %arg1: i32, %arg2: memref<1x16x3xf32, #tpu.memory_space<vmem>>, %arg3: memref<1x16x3xf32, #tpu.memory_space<vmem>>, %arg4: memref<1x16x128xf32, #tpu.memory_space<vmem>>, %arg5: memref<10x10xf32, #tpu.memory_space<vmem>>, %arg6: memref<1x10xf32, #tpu.memory_space<vmem>>, %arg7: memref<10x10xf32, #tpu.memory_space<vmem>>, %arg8: memref<1x10xf32, #tpu.memory_space<vmem>>, %arg9: memref<10x1xf32, #tpu.memory_space<vmem>>, %arg10: memref<1x1xf32, #tpu.memory_space<vmem>>, %arg11: memref<1x16x128xf32, #tpu.memory_space<vmem>>) attributes {dimension_semantics = [#tpu.dimension_semantics<parallel>, #tpu.dimension_semantics<parallel>], iteration_bounds = array<i64: 2, 1>, scalar_prefetch = 0 : i64, scratch_operands = 0 : i64, tpu.core_type = #tpu.core_type<tc>, window_params = [{transform_indices = @transform_0, window_bounds = array<i64: 1, 16, 3>}, {transform_indices = @transform_1, window_bounds = array<i64: 1, 16, 3>}, {transform_indices = @transform_2, window_bounds = array<i64: 1, 16, 128>}, {pipeline_mode = #tpu.pipeline_mode<synchronous>, transform_indices = @transform_3, window_bounds = array<i64: 10, 10>}, {pipeline_mode = #tpu.pipeline_mode<synchronous>, transform_indices = @transform_4, window_bounds = array<i64: 1, 10>}, {pipeline_mode = #tpu.pipeline_mode<synchronous>, transform_indices = @transform_5, window_bounds = array<i64: 10, 10>}, {pipeline_mode = #tpu.pipeline_mode<synchronous>, transform_indices = @transform_6, window_bounds = array<i64: 1, 10>}, {pipeline_mode = #tpu.pipeline_mode<synchronous>, transform_indices = @transform_7, window_bounds = array<i64: 10, 1>}, {pipeline_mode = #tpu.pipeline_mode<synchronous>, transform_indices = @transform_8, window_bounds = array<i64: 1, 1>}, {transform_indices = @transform_9, window_bounds = array<i64: 1, 16, 128>}]} {
    %c0 = arith.constant 0 : index
    %c0_0 = arith.constant 0 : index
    %c0_1 = arith.constant 0 : index
    %0 = vector.load %arg2[%c0, %c0_0, %c0_1] : memref<1x16x3xf32, #tpu.memory_space<vmem>>, vector<1x16x3xf32>
    %1 = vector.shape_cast %0 : vector<1x16x3xf32> to vector<16x3xf32>
    %c0_2 = arith.constant 0 : index
    %c0_3 = arith.constant 0 : index
    %c0_4 = arith.constant 0 : index
    %2 = vector.load %arg3[%c0_2, %c0_3, %c0_4] : memref<1x16x3xf32, #tpu.memory_space<vmem>>, vector<1x16x3xf32>
    %3 = vector.shape_cast %2 : vector<1x16x3xf32> to vector<16x3xf32>
    %c0_5 = arith.constant 0 : index
    %c0_6 = arith.constant 0 : index
    %c0_7 = arith.constant 0 : index
    %4 = vector.load %arg4[%c0_5, %c0_6, %c0_7] : memref<1x16x128xf32, #tpu.memory_space<vmem>>, vector<1x16x128xf32>
    %5 = vector.shape_cast %4 : vector<1x16x128xf32> to vector<16x128xf32>
    "tpu.trace_start"() <{level = 10 : i32, message = "md,nd->mn"}> : () -> ()
    %cst = arith.constant dense<0.000000e+00> : vector<16x16xf32>
    %6 = tpu.matmul %3, %1, %cst {dimension_numbers = #tpu.dot_dimension_numbers<[1], [1], [0], [0], [0, 0, 1, 0], [], []>} : vector<16x3xf32>, vector<16x3xf32>, vector<16x16xf32> -> vector<16x16xf32>
    "tpu.trace_stop"() : () -> ()
    %7 = arith.mulf %3, %3 : vector<16x3xf32>
    %cst_8 = arith.constant dense<0.000000e+00> : vector<16xf32>
    %8 = vector.multi_reduction <add>, %7, %cst_8 [1] : vector<16x3xf32> to vector<16xf32>
    %9 = vector.shape_cast %8 : vector<16xf32> to vector<16x1xf32>
    %cst_9 = arith.constant 1.000000e+00 : f32
    %10 = vector.broadcast %cst_9 : f32 to vector<1x3xf32>
    %11 = arith.mulf %1, %1 : vector<16x3xf32>
    "tpu.trace_start"() <{level = 10 : i32, message = "od,nd->on"}> : () -> ()
    %cst_10 = arith.constant dense<0.000000e+00> : vector<1x16xf32>
    %12 = tpu.matmul %10, %11, %cst_10 {dimension_numbers = #tpu.dot_dimension_numbers<[1], [1], [0], [0], [0, 0, 1, 0], [], []>} : vector<1x3xf32>, vector<16x3xf32>, vector<1x16xf32> -> vector<1x16xf32>
    "tpu.trace_stop"() : () -> ()
    %13 = vector.broadcast %9 : vector<16x1xf32> to vector<16x16xf32>
    %14 = vector.broadcast %12 : vector<1x16xf32> to vector<16x16xf32>
    %15 = arith.addf %13, %14 : vector<16x16xf32>
    %cst_11 = arith.constant 2.000000e+00 : f32
    %16 = vector.broadcast %cst_11 : f32 to vector<16x16xf32>
    %17 = arith.mulf %16, %6 : vector<16x16xf32>
    %18 = arith.subf %15, %17 : vector<16x16xf32>
    %19 = tpu.iota {dimensions = array<i32: 1>} : vector<1x16xi32>
    %cst_12 = arith.constant dense<0x7F800000> : vector<16xf32>
    %20 = vector.multi_reduction <minimumf>, %18, %cst_12 [1] : vector<16x16xf32> to vector<16xf32>
    %21 = vector.shape_cast %20 : vector<16xf32> to vector<16x1xf32>
    %22 = vector.broadcast %21 : vector<16x1xf32> to vector<16x16xf32>
    %23 = arith.cmpf ole, %18, %22 : vector<16x16xf32>
    %c16_i32 = arith.constant 16 : i32
    %24 = vector.shape_cast %19 : vector<1x16xi32> to vector<1x16xi32>
    %25 = vector.broadcast %24 : vector<1x16xi32> to vector<16x16xi32>
    %26 = vector.broadcast %c16_i32 : i32 to vector<16x16xi32>
    %27 = arith.select %23, %25, %26 : vector<16x16xi1>, vector<16x16xi32>
    %cst_13 = arith.constant dense<2147483647> : vector<16xi32>
    %28 = vector.multi_reduction <minsi>, %27, %cst_13 [1] : vector<16x16xi32> to vector<16xi32>
    %29 = vector.shape_cast %28 : vector<16xi32> to vector<16x1xi32>
    %30 = vector.broadcast %19 : vector<1x16xi32> to vector<16x16xi32>
    %31 = vector.broadcast %29 : vector<16x1xi32> to vector<16x16xi32>
    %32 = arith.cmpi eq, %30, %31 : vector<16x16xi32>
    %cst_14 = arith.constant 0x7F800000 : f32
    %33 = vector.broadcast %cst_14 : f32 to vector<16x16xf32>
    %34 = arith.select %32, %33, %18 : vector<16x16xi1>, vector<16x16xf32>
    %cst_15 = arith.constant dense<0x7F800000> : vector<16xf32>
    %35 = vector.multi_reduction <minimumf>, %34, %cst_15 [1] : vector<16x16xf32> to vector<16xf32>
    %36 = vector.shape_cast %35 : vector<16xf32> to vector<16x1xf32>
    %37 = vector.broadcast %36 : vector<16x1xf32> to vector<16x16xf32>
    %38 = arith.cmpf ole, %34, %37 : vector<16x16xf32>
    %c16_i32_16 = arith.constant 16 : i32
    %39 = vector.shape_cast %19 : vector<1x16xi32> to vector<1x16xi32>
    %40 = vector.broadcast %39 : vector<1x16xi32> to vector<16x16xi32>
    %41 = vector.broadcast %c16_i32_16 : i32 to vector<16x16xi32>
    %42 = arith.select %38, %40, %41 : vector<16x16xi1>, vector<16x16xi32>
    %cst_17 = arith.constant dense<2147483647> : vector<16xi32>
    %43 = vector.multi_reduction <minsi>, %42, %cst_17 [1] : vector<16x16xi32> to vector<16xi32>
    %44 = vector.shape_cast %43 : vector<16xi32> to vector<16x1xi32>
    %45 = vector.broadcast %19 : vector<1x16xi32> to vector<16x16xi32>
    %46 = vector.broadcast %44 : vector<16x1xi32> to vector<16x16xi32>
    %47 = arith.cmpi eq, %45, %46 : vector<16x16xi32>
    %cst_18 = arith.constant 0x7F800000 : f32
    %48 = vector.broadcast %cst_18 : f32 to vector<16x16xf32>
    %49 = arith.select %47, %48, %34 : vector<16x16xi1>, vector<16x16xf32>
    %50 = arith.extui %47 : vector<16x16xi1> to vector<16x16xi32>
    %51 = arith.sitofp %50 : vector<16x16xi32> to vector<16x16xf32>
    %cst_19 = arith.constant dense<0.000000e+00> : vector<16x3xf32>
    %52 = tpu.matmul %51, %1, %cst_19 {dimension_numbers = #tpu.dot_dimension_numbers<[1], [0], [0], [1], [0, 0, 1, 1], [], []>} : vector<16x16xf32>, vector<16x3xf32>, vector<16x3xf32> -> vector<16x3xf32>
    %cst_20 = arith.constant dense<0x7F800000> : vector<16xf32>
    %53 = vector.multi_reduction <minimumf>, %49, %cst_20 [1] : vector<16x16xf32> to vector<16xf32>
    %54 = vector.shape_cast %53 : vector<16xf32> to vector<16x1xf32>
    %55 = vector.broadcast %54 : vector<16x1xf32> to vector<16x16xf32>
    %56 = arith.cmpf ole, %49, %55 : vector<16x16xf32>
    %c16_i32_21 = arith.constant 16 : i32
    %57 = vector.shape_cast %19 : vector<1x16xi32> to vector<1x16xi32>
    %58 = vector.broadcast %57 : vector<1x16xi32> to vector<16x16xi32>
    %59 = vector.broadcast %c16_i32_21 : i32 to vector<16x16xi32>
    %60 = arith.select %56, %58, %59 : vector<16x16xi1>, vector<16x16xi32>
    %cst_22 = arith.constant dense<2147483647> : vector<16xi32>
    %61 = vector.multi_reduction <minsi>, %60, %cst_22 [1] : vector<16x16xi32> to vector<16xi32>
    %62 = vector.shape_cast %61 : vector<16xi32> to vector<16x1xi32>
    %63 = vector.broadcast %19 : vector<1x16xi32> to vector<16x16xi32>
    %64 = vector.broadcast %62 : vector<16x1xi32> to vector<16x16xi32>
    %65 = arith.cmpi eq, %63, %64 : vector<16x16xi32>
    %cst_23 = arith.constant 0x7F800000 : f32
    %66 = vector.broadcast %cst_23 : f32 to vector<16x16xf32>
    %67 = arith.select %65, %66, %49 : vector<16x16xi1>, vector<16x16xf32>
    %68 = arith.extui %65 : vector<16x16xi1> to vector<16x16xi32>
    %69 = arith.sitofp %68 : vector<16x16xi32> to vector<16x16xf32>
    %cst_24 = arith.constant dense<0.000000e+00> : vector<16x3xf32>
    %70 = tpu.matmul %69, %1, %cst_24 {dimension_numbers = #tpu.dot_dimension_numbers<[1], [0], [0], [1], [0, 0, 1, 1], [], []>} : vector<16x16xf32>, vector<16x3xf32>, vector<16x3xf32> -> vector<16x3xf32>
    %cst_25 = arith.constant dense<0x7F800000> : vector<16xf32>
    %71 = vector.multi_reduction <minimumf>, %67, %cst_25 [1] : vector<16x16xf32> to vector<16xf32>
    %72 = vector.shape_cast %71 : vector<16xf32> to vector<16x1xf32>
    %73 = vector.broadcast %72 : vector<16x1xf32> to vector<16x16xf32>
    %74 = arith.cmpf ole, %67, %73 : vector<16x16xf32>
    %c16_i32_26 = arith.constant 16 : i32
    %75 = vector.shape_cast %19 : vector<1x16xi32> to vector<1x16xi32>
    %76 = vector.broadcast %75 : vector<1x16xi32> to vector<16x16xi32>
    %77 = vector.broadcast %c16_i32_26 : i32 to vector<16x16xi32>
    %78 = arith.select %74, %76, %77 : vector<16x16xi1>, vector<16x16xi32>
    %cst_27 = arith.constant dense<2147483647> : vector<16xi32>
    %79 = vector.multi_reduction <minsi>, %78, %cst_27 [1] : vector<16x16xi32> to vector<16xi32>
    %80 = vector.shape_cast %79 : vector<16xi32> to vector<16x1xi32>
    %81 = vector.broadcast %19 : vector<1x16xi32> to vector<16x16xi32>
    %82 = vector.broadcast %80 : vector<16x1xi32> to vector<16x16xi32>
    %83 = arith.cmpi eq, %81, %82 : vector<16x16xi32>
    %84 = arith.extui %83 : vector<16x16xi1> to vector<16x16xi32>
    %85 = arith.sitofp %84 : vector<16x16xi32> to vector<16x16xf32>
    %cst_28 = arith.constant dense<0.000000e+00> : vector<16x3xf32>
    %86 = tpu.matmul %85, %1, %cst_28 {dimension_numbers = #tpu.dot_dimension_numbers<[1], [0], [0], [1], [0, 0, 1, 1], [], []>} : vector<16x16xf32>, vector<16x3xf32>, vector<16x3xf32> -> vector<16x3xf32>
    %cst_29 = arith.constant 0.000000e+00 : f32
    %87 = vector.broadcast %cst_29 : f32 to vector<16x3xf32>
    %cst_30 = arith.constant 0.000000e+00 : f32
    %88 = vector.broadcast %cst_30 : f32 to vector<16x1xf32>
    %89 = tpu.concatenate %3, %3, %87, %88 in 1 : vector<16x3xf32>, vector<16x3xf32>, vector<16x3xf32>, vector<16x1xf32> -> vector<16x10xf32>
    %90 = arith.subf %3, %52 : vector<16x3xf32>
    %91 = arith.mulf %90, %90 : vector<16x3xf32>
    %cst_31 = arith.constant dense<0.000000e+00> : vector<16xf32>
    %92 = vector.multi_reduction <add>, %91, %cst_31 [1] : vector<16x3xf32> to vector<16xf32>
    %93 = vector.shape_cast %92 : vector<16xf32> to vector<16x1xf32>
    %94 = math.sqrt %93 : vector<16x1xf32>
    %95 = tpu.concatenate %3, %52, %90, %94 in 1 : vector<16x3xf32>, vector<16x3xf32>, vector<16x3xf32>, vector<16x1xf32> -> vector<16x10xf32>
    %96 = arith.subf %3, %70 : vector<16x3xf32>
    %97 = arith.mulf %96, %96 : vector<16x3xf32>
    %cst_32 = arith.constant dense<0.000000e+00> : vector<16xf32>
    %98 = vector.multi_reduction <add>, %97, %cst_32 [1] : vector<16x3xf32> to vector<16xf32>
    %99 = vector.shape_cast %98 : vector<16xf32> to vector<16x1xf32>
    %100 = math.sqrt %99 : vector<16x1xf32>
    %101 = tpu.concatenate %3, %70, %96, %100 in 1 : vector<16x3xf32>, vector<16x3xf32>, vector<16x3xf32>, vector<16x1xf32> -> vector<16x10xf32>
    %102 = arith.subf %3, %86 : vector<16x3xf32>
    %103 = arith.mulf %102, %102 : vector<16x3xf32>
    %cst_33 = arith.constant dense<0.000000e+00> : vector<16xf32>
    %104 = vector.multi_reduction <add>, %103, %cst_33 [1] : vector<16x3xf32> to vector<16xf32>
    %105 = vector.shape_cast %104 : vector<16xf32> to vector<16x1xf32>
    %106 = math.sqrt %105 : vector<16x1xf32>
    %107 = tpu.concatenate %3, %86, %102, %106 in 1 : vector<16x3xf32>, vector<16x3xf32>, vector<16x3xf32>, vector<16x1xf32> -> vector<16x10xf32>
    %108 = tpu.concatenate %89, %95, %101, %107 in 0 : vector<16x10xf32>, vector<16x10xf32>, vector<16x10xf32>, vector<16x10xf32> -> vector<64x10xf32>
    %c0_34 = arith.constant 0 : index
    %c0_35 = arith.constant 0 : index
    %109 = vector.load %arg5[%c0_34, %c0_35] : memref<10x10xf32, #tpu.memory_space<vmem>>, vector<10x10xf32>
    %cst_36 = arith.constant dense<0.000000e+00> : vector<64x10xf32>
    %110 = tpu.matmul %108, %109, %cst_36 {dimension_numbers = #tpu.dot_dimension_numbers<[1], [0], [0], [1], [0, 0, 1, 1], [], []>} : vector<64x10xf32>, vector<10x10xf32>, vector<64x10xf32> -> vector<64x10xf32>
    %c0_37 = arith.constant 0 : index
    %c0_38 = arith.constant 0 : index
    %111 = vector.load %arg6[%c0_37, %c0_38] : memref<1x10xf32, #tpu.memory_space<vmem>>, vector<1x10xf32>
    %112 = vector.broadcast %111 : vector<1x10xf32> to vector<64x10xf32>
    %113 = arith.addf %110, %112 : vector<64x10xf32>
    %cst_39 = arith.constant 0.000000e+00 : f32
    %114 = vector.broadcast %cst_39 : f32 to vector<64x10xf32>
    %115 = arith.cmpf ogt, %113, %114 : vector<64x10xf32>
    %cst_40 = arith.constant 2.000000e-01 : f32
    %116 = vector.broadcast %cst_40 : f32 to vector<64x10xf32>
    %117 = arith.mulf %116, %113 : vector<64x10xf32>
    %118 = arith.select %115, %113, %117 : vector<64x10xi1>, vector<64x10xf32>
    %c0_41 = arith.constant 0 : index
    %c0_42 = arith.constant 0 : index
    %119 = vector.load %arg7[%c0_41, %c0_42] : memref<10x10xf32, #tpu.memory_space<vmem>>, vector<10x10xf32>
    %cst_43 = arith.constant dense<0.000000e+00> : vector<64x10xf32>
    %120 = tpu.matmul %118, %119, %cst_43 {dimension_numbers = #tpu.dot_dimension_numbers<[1], [0], [0], [1], [0, 0, 1, 1], [], []>} : vector<64x10xf32>, vector<10x10xf32>, vector<64x10xf32> -> vector<64x10xf32>
    %c0_44 = arith.constant 0 : index
    %c0_45 = arith.constant 0 : index
    %121 = vector.load %arg8[%c0_44, %c0_45] : memref<1x10xf32, #tpu.memory_space<vmem>>, vector<1x10xf32>
    %122 = vector.broadcast %121 : vector<1x10xf32> to vector<64x10xf32>
    %123 = arith.addf %120, %122 : vector<64x10xf32>
    %cst_46 = arith.constant 0.000000e+00 : f32
    %124 = vector.broadcast %cst_46 : f32 to vector<64x10xf32>
    %125 = arith.cmpf ogt, %123, %124 : vector<64x10xf32>
    %cst_47 = arith.constant 2.000000e-01 : f32
    %126 = vector.broadcast %cst_47 : f32 to vector<64x10xf32>
    %127 = arith.mulf %126, %123 : vector<64x10xf32>
    %128 = arith.select %125, %123, %127 : vector<64x10xi1>, vector<64x10xf32>
    %c0_48 = arith.constant 0 : index
    %c0_49 = arith.constant 0 : index
    %129 = vector.load %arg9[%c0_48, %c0_49] : memref<10x1xf32, #tpu.memory_space<vmem>>, vector<10x1xf32>
    %cst_50 = arith.constant dense<0.000000e+00> : vector<64x1xf32>
    %130 = tpu.matmul %128, %129, %cst_50 {dimension_numbers = #tpu.dot_dimension_numbers<[1], [0], [0], [1], [0, 0, 1, 1], [], []>} : vector<64x10xf32>, vector<10x1xf32>, vector<64x1xf32> -> vector<64x1xf32>
    %c0_51 = arith.constant 0 : index
    %c0_52 = arith.constant 0 : index
    %131 = vector.load %arg10[%c0_51, %c0_52] : memref<1x1xf32, #tpu.memory_space<vmem>>, vector<1x1xf32>
    %132 = vector.broadcast %131 : vector<1x1xf32> to vector<64x1xf32>
    %133 = arith.addf %130, %132 : vector<64x1xf32>
    %cst_53 = arith.constant 0.000000e+00 : f32
    %134 = vector.broadcast %cst_53 : f32 to vector<16x16xf32>
    %135 = vector.extract_strided_slice %133 {offsets = [0, 0], sizes = [16, 1], strides = [1, 1]} : vector<64x1xf32> to vector<16x1xf32>
    %136 = vector.broadcast %19 : vector<1x16xi32> to vector<16x16xi32>
    %137 = vector.broadcast %29 : vector<16x1xi32> to vector<16x16xi32>
    %138 = arith.cmpi eq, %136, %137 : vector<16x16xi32>
    %139 = vector.shape_cast %135 : vector<16x1xf32> to vector<16x1xf32>
    %140 = vector.broadcast %139 : vector<16x1xf32> to vector<16x16xf32>
    %141 = arith.select %138, %140, %134 : vector<16x16xi1>, vector<16x16xf32>
    %142 = vector.extract_strided_slice %133 {offsets = [16, 0], sizes = [16, 1], strides = [1, 1]} : vector<64x1xf32> to vector<16x1xf32>
    %143 = vector.broadcast %19 : vector<1x16xi32> to vector<16x16xi32>
    %144 = vector.broadcast %44 : vector<16x1xi32> to vector<16x16xi32>
    %145 = arith.cmpi eq, %143, %144 : vector<16x16xi32>
    %146 = vector.shape_cast %142 : vector<16x1xf32> to vector<16x1xf32>
    %147 = vector.broadcast %146 : vector<16x1xf32> to vector<16x16xf32>
    %148 = arith.select %145, %147, %141 : vector<16x16xi1>, vector<16x16xf32>
    %149 = vector.extract_strided_slice %133 {offsets = [32, 0], sizes = [16, 1], strides = [1, 1]} : vector<64x1xf32> to vector<16x1xf32>
    %150 = vector.broadcast %19 : vector<1x16xi32> to vector<16x16xi32>
    %151 = vector.broadcast %62 : vector<16x1xi32> to vector<16x16xi32>
    %152 = arith.cmpi eq, %150, %151 : vector<16x16xi32>
    %153 = vector.shape_cast %149 : vector<16x1xf32> to vector<16x1xf32>
    %154 = vector.broadcast %153 : vector<16x1xf32> to vector<16x16xf32>
    %155 = arith.select %152, %154, %148 : vector<16x16xi1>, vector<16x16xf32>
    %156 = vector.extract_strided_slice %133 {offsets = [48, 0], sizes = [16, 1], strides = [1, 1]} : vector<64x1xf32> to vector<16x1xf32>
    %157 = vector.broadcast %19 : vector<1x16xi32> to vector<16x16xi32>
    %158 = vector.broadcast %80 : vector<16x1xi32> to vector<16x16xi32>
    %159 = arith.cmpi eq, %157, %158 : vector<16x16xi32>
    %160 = vector.shape_cast %156 : vector<16x1xf32> to vector<16x1xf32>
    %161 = vector.broadcast %160 : vector<16x1xf32> to vector<16x16xf32>
    %162 = arith.select %159, %161, %155 : vector<16x16xi1>, vector<16x16xf32>
    %cst_54 = arith.constant dense<0.000000e+00> : vector<16x128xf32>
    %163 = tpu.matmul %162, %5, %cst_54 {dimension_numbers = #tpu.dot_dimension_numbers<[1], [0], [0], [1], [0, 0, 1, 1], [], []>} : vector<16x16xf32>, vector<16x128xf32>, vector<16x128xf32> -> vector<16x128xf32>
    %c0_55 = arith.constant 0 : index
    %c0_56 = arith.constant 0 : index
    %c0_57 = arith.constant 0 : index
    %164 = vector.load %arg11[%c0_55, %c0_56, %c0_57] : memref<1x16x128xf32, #tpu.memory_space<vmem>>, vector<1x16x128xf32>
    %165 = vector.shape_cast %164 : vector<1x16x128xf32> to vector<16x128xf32>
    %166 = vector.shape_cast %163 : vector<16x128xf32> to vector<1x16x128xf32>
    tpu.vector_store %arg11[%c0_55, %c0_56, %c0_57], %166 {strides = array<i32>} : memref<1x16x128xf32, #tpu.memory_space<vmem>>, vector<1x16x128xf32>,
    return
  }
  func.func @transform_0(%arg0: i32, %arg1: i32) -> (i32, i32, i32) {
    %c0_i32 = arith.constant 0 : i32
    %c0_i32_0 = arith.constant 0 : i32
    %c0_i32_1 = arith.constant 0 : i32
    return %arg0, %c0_i32, %c0_i32_0 : i32, i32, i32
  }
  func.func @transform_1(%arg0: i32, %arg1: i32) -> (i32, i32, i32) {
    %c0_i32 = arith.constant 0 : i32
    %c0_i32_0 = arith.constant 0 : i32
    return %arg0, %arg1, %c0_i32 : i32, i32, i32
  }
  func.func @transform_2(%arg0: i32, %arg1: i32) -> (i32, i32, i32) {
    %c0_i32 = arith.constant 0 : i32
    %c0_i32_0 = arith.constant 0 : i32
    %c0_i32_1 = arith.constant 0 : i32
    return %arg0, %c0_i32, %c0_i32_0 : i32, i32, i32
  }
  func.func @transform_3(%arg0: i32, %arg1: i32) -> (i32, i32) {
    %c0_i32 = arith.constant 0 : i32
    %c0_i32_0 = arith.constant 0 : i32
    %c0_i32_1 = arith.constant 0 : i32
    return %c0_i32, %c0_i32_0 : i32, i32
  }
  func.func @transform_4(%arg0: i32, %arg1: i32) -> (i32, i32) {
    %c0_i32 = arith.constant 0 : i32
    %c0_i32_0 = arith.constant 0 : i32
    %c0_i32_1 = arith.constant 0 : i32
    return %c0_i32, %c0_i32_0 : i32, i32
  }
  func.func @transform_5(%arg0: i32, %arg1: i32) -> (i32, i32) {
    %c0_i32 = arith.constant 0 : i32
    %c0_i32_0 = arith.constant 0 : i32
    %c0_i32_1 = arith.constant 0 : i32
    return %c0_i32, %c0_i32_0 : i32, i32
  }
  func.func @transform_6(%arg0: i32, %arg1: i32) -> (i32, i32) {
    %c0_i32 = arith.constant 0 : i32
    %c0_i32_0 = arith.constant 0 : i32
    %c0_i32_1 = arith.constant 0 : i32
    return %c0_i32, %c0_i32_0 : i32, i32
  }
  func.func @transform_7(%arg0: i32, %arg1: i32) -> (i32, i32) {
    %c0_i32 = arith.constant 0 : i32
    %c0_i32_0 = arith.constant 0 : i32
    %c0_i32_1 = arith.constant 0 : i32
    return %c0_i32, %c0_i32_0 : i32, i32
  }
  func.func @transform_8(%arg0: i32, %arg1: i32) -> (i32, i32) {
    %c0_i32 = arith.constant 0 : i32
    %c0_i32_0 = arith.constant 0 : i32
    %c0_i32_1 = arith.constant 0 : i32
    return %c0_i32, %c0_i32_0 : i32, i32
  }
  func.func @transform_9(%arg0: i32, %arg1: i32) -> (i32, i32, i32) {
    %c0_i32 = arith.constant 0 : i32
    %c0_i32_0 = arith.constant 0 : i32
    return %arg0, %arg1, %c0_i32 : i32, i32, i32
  }
}

</mosaic_0001>

<bundles_post_ra>
// kernel: tpu_custom_call.1
= control target key start
LH: loop header
LB: loop body
LE: loop exit
PB: predicated region body
PF: predicated region fallthrough
CT: control target
= control target key end

     0   :  { %s2842_s0 = inlined_call_operand.vmem [shape: f32[2,16,3], index: 0, kind: input, shape index: {}]   ;;  %s2843_s1 = inlined_call_operand.vmem [shape: f32[2,16,3], index: 1, kind: input, shape index: {}]   ;;  %s2844_s2 = inlined_call_operand.vmem [shape: f32[2,16,128], index: 2, kind: input, shape index: {}]   ;;  %s2845_s3 = inlined_call_operand.vmem [shape: f32[10,10], index: 3, kind: input, shape index: {}]   ;;  %s2846_s4 = inlined_call_operand.vmem [shape: f32[1,10], index: 4, kind: input, shape index: {}]   ;;  %s2847_s5 = inlined_call_operand.vmem [shape: f32[10,10], index: 5, kind: input, shape index: {}]   ;;  %s2848_s6 = inlined_call_operand.vmem [shape: f32[1,10], index: 6, kind: input, shape index: {}]   ;;  %s2849_s7 = inlined_call_operand.vmem [shape: f32[10,1], index: 7, kind: input, shape index: {}]   ;;  %s2850_s8 = inlined_call_operand.<no memory space> [shape: f32[1,1], index: 8, kind: input, shape index: {}]   ;;  %s2851_s9 = inlined_call_operand.hbm [shape: f32[2,16,128], index: 9, kind: output, shape index: {}]  }
   0x1   :  { %v14_v0 = vstv %s2850_s8 }
   0x2   :  { %15 = vst [vmem:[#allocation2] sm:$0x1] %v14_v0 }
   0x3   :  { %16 = vsyncpa [#allocation4], 0 }
   0x4   :  { %18 = vsyncpa [#allocation4 + $0x1], 0  ;;  %s2386_s11 = smov 0   ;;  %s2388_s12 = smov 0  }
   0x5   :  { %s2390_s13 = smov 0   ;;  %s2392_s14 = smov 0  }
   0x6   :  { %s2394_s15 = smov 0   ;;  %s2396_s16 = smov 0  }
   0x7 LB: > { %s1904_s8 = sadd.s32 4294967295, %s2320_s16   ;;  %s1905_s17 = sadd.s32 4294967294, %s2320_s16   ;;  %s2320_s16 = sphi %s2396_s16, %s24_s16   ;;  %s2316_s15 = sphi %s2394_s15, %s2867_s15   ;;  %s2312_s14 = sphi %s2392_s14, %s2866_s14   ;;  %s2308_s13 = sphi %s2390_s13, %s2865_s13   ;;  %s2304_s12 = sphi %s2388_s12, %s2864_s12   ;;  %s2300_s11 = sphi %s2386_s11, %s2863_s11  }
   0x8   : > { %s36_s18 = sadd.s32 1, %s2316_s15  ;;  %s251_s19 = sadd.s32 1, %s2308_s13 }
   0x9   : > { %p38_p0 = scmp.ge.s32.totalorder %s36_s18, 2  ;;  %p261_p1 = scmp.ne.s32.totalorder %s2308_s13, %s2304_s12 }
   0xa   : > { %p262_p2 = scmp.eq.s32.totalorder %s1904_s8, 1  ;;  %p267_p3 = scmp.ne.s32.totalorder %s2304_s12, %s2300_s11 }
   0xb   : > { %s2869_s18 = smov (%p38_p0, %s36_s18), 0  ;;  %p268_p5 = scmp.eq.s32.totalorder %s1905_s17, 1 }
   0xc   : > { %p2426_p4 = por %p262_p2, %p261_p1  ;;  %s246_s21 = ssub.s32 %s2316_s15, %s2869_s18 }
   0xd   : > { %p1908_p6 = scmp.ge.s32.totalorder %s2320_s16, 1  ;;  %p249_p7 = scmp.eq.s32.totalorder %s246_s21, 0 }
   0xe   : > { %p2433_p8 = por %p268_p5, %p267_p3  ;;  %p333_p9 = scmp.lt.s32.totalorder %s2320_s16, 3 }
   0xf   : > { %s2439_s23 = scalar_select %p249_p7, %s2308_s13, %s251_s19  }
  0x10   : > { %p334_p10 = pnand %p1908_p6, %p333_p9 }
  0x11   : > { %p383_p11 = scmp.lt.s32.totalorder (!%p334_p10), %s2312_s14, 1  ;;  %v2322_v1 = vmov (!%p334_p10), 0.0|0.0   ;;  %vm2323_vm0 = vmmov (!%p334_p10), 0   ;;  %v2324_v2 = vmov (!%p334_p10), 0.0   ;;  %vm410_vm1 = vcmask (!%p334_p10), 23552   ;;  %s2328_s26 = smov (!%p334_p10), 6  }
  0x12   : > { %337 = sbr.rel (%p334_p10) target bundleno = 3448 (0xd78), region = 56  ;;  %2125 = vmatprep.subr.bf16.mxu1 (!%p334_p10), %v2322_v1  ;;  %2040 = vmatprep.mubr.msk.f32.mxu1 (!%p334_p10), %vm2323_vm0, %v2324_v2  ;;  %vm2452_vm2 = vmpackc.low (!%p334_p10), %vm410_vm1, %vm410_vm1  ;;  %v2325_v16 = vmov (!%p334_p10), 1.0   ;;  %v587_v17 = vlaneseq (!%p334_p10)  ;;  %vm2852_vm3 = vcmask (!%p334_p10), 130048   ;;  %s1975_s19 = sshll.u32 (!%p334_p10), %s2312_s14, 8 }
  0x14   : > { %v588_v19 = vshrl.u32 (!%p334_p10), %v587_v17, 7  ;;  %v2490_v35 = vand.u32 (!%p334_p10), 127, %v587_v17 }
  0x16   : > { %v589_v20 = vsub.s32 (!%p334_p10), 0, %v588_v19 }
  0x19   : > { %s384_s24 = scalar_select %p383_p11, %s2312_s14, 1 }
  0x1a   : > { %s2330_s14 = smov [#allocation3]  }
  0x1b   : > { %s2444_s25 = sshll.u32 %s384_s24, 4  ;;  %s2326_s24 = smov 3  }
  0x1c   : > { %s387_s28 = scalar_lea.vmem %s2842_s0, %s2444_s25  ;;  %s396_s10 = scalar_lea.vmem %s2843_s1, %s2444_s25 }
  0x1d   : > { %v404_v4 = vld [vmem:[%s387_s28] sm:$0xff]  ;;  %v405_v5 = vld [vmem:[%s387_s28 + $0x8] sm:$0xff]  ;;  %s402_s30 = scalar_lea.vmem %s2844_s2, %s2444_s25  ;;  %s380_s25 = sand.u32 1, %s2304_s12  }
  0x1e   : > { %v2460_v6 = vld [vmem:[%s396_s10] sm:$0xff]  ;;  %v2462_v7 = vpack.c.bf16 %v405_v5, %v404_v4  ;;  %v506_v8 = vmul.f32 %v404_v4, %v404_v4  ;;  %v507_v9 = vmul.f32 %v405_v5, %v405_v5  ;;  %v2466_v10 = vld [vmem:[%s396_s10 + $0x8] sm:$0xff]  ;;  %s1909_s10 = sshll.u32 %s380_s25, 4  ;;  %s2796_s27 = scalar_lea.sflag [#allocation4], %s380_s25 }
  0x1f   : > { %2033 = vmatprep.mubr.msk.f32.mxu0 %vm410_vm1, %v2460_v6  ;;  %v498_v11 = vmul.f32 %v2460_v6, %v2460_v6  ;;  %v499_v12 = vmul.f32 %v2466_v10, %v2466_v10  ;;  %s382_s8 = scalar_lea.vmem [#allocation3], %s1909_s10  ;;  %s2246_s29 = sshll.u32 %s2330_s14, 4  ;;  %s2247_s29 = int_to_ptr.vmem [resolvable:$false] %s2246_s29 }
  0x20   : > { %2121 = vmatprep.subr.msk.bf16.mxu0 %vm2452_vm2, %v2462_v7  ;;  %v2126_v13 = vpack.c.bf16 %v507_v9, %v506_v8  ;;  %s1801_s17 = sshll.u32 %s382_s8, 4  ;;  %s2789_s17 = int_to_ptr.vmem [resolvable:$true] %s1801_s17 }
  0x21   : > { %v500_v14 = vsel %vm410_vm1, %v498_v11, 0.0  ;;  %2124 = vmatpush3.bf16.xpose.msk.msra.mxu0 %vm2452_vm2, %v2462_v7  ;;  %v503_v15 = vsel %vm410_vm1, %v499_v12, 0.0  ;;  %s2242_s28 = scalar_lea.vmem %s2789_s17, 256  ;;  %p2249_p1 = scmp.lt.s32.totalorder %s2789_s17, %s2247_s29 }
  0x22   : > { %501 = vadd.xlane.f32.xlu0 %v500_v14  ;;  %2128 = vmatpush3.bf16.xpose.msk.msra.mxu1 %vm2452_vm2, %v2126_v13  ;;  %p2243_p12 = scmp.ne.s32.totalorder %s2789_s17, %s2242_s28 }
  0x23   : > { %2130 = vmatprep.subr.bf16.mxu0 %v2462_v7 }
  0x24   : > { %p2244_p13 = pnand %p2243_p12, %p2426_p4 }
  0x26   : > { %504 = vadd.xlane.f32.xlu0 %v503_v15  ;;  %p2245_p0 = pneg %p2244_p13 }
  0x28   : > { %2034 = vmatmul.mubr.msk.f32.vlgmr.msra.gmra.mrb[0].mxu0 %vm410_vm1, %v2466_v10 }
  0x29   : > { %2041 = vmatmul.mubr.msk.f32.vlgmr.msra.gmra.mrb[0].mxu1 %vm410_vm1, %v2325_v16  ;;  %2132 = vmatpush3.bf16.msra.mxu0 %v2462_v7 }
  0x2a   : > { %2134 = vmatprep.subr.bf16.mxu0 %v2462_v7 }
  0xaf   : > { %v502_v18 = vpop.xlane.xlu0 %501 }
  0xb3   : > { %v505_v22 = vpop.xlane.xlu0 %504 }
  0xfb   : > { %v2035_v21 = vpop.f32.mrb[0].mxu0 }
  0xfc   : > { %v583_v23 = vpop.f32.mrb[0].mxu1  ;;  %v489_v24 = vpop.f32.mrb[1].mxu0  ;;  %v594_v25 = vmul.f32 2.0, %v2035_v21 }
  0xfd   : > { %v590_v26 = vrot.slane %v583_v23, %v589_v20  ;;  %v593_v27 = vmul.f32 2.0, %v489_v24  ;;  %v2042_v28 = vpop.f32.mrb[1].mxu1 }
  0xff   : > { %v591_v29 = vadd.f32 %v590_v26, %v502_v18  ;;  %v592_v30 = vadd.f32 %v590_v26, %v505_v22 }
 0x101   : > { %v595_v31 = vsub.f32 %v591_v29, %v593_v27  ;;  %v596_v32 = vsub.f32 %v592_v30, %v594_v25 }
 0x103   : > { %v600_v33 = vsel %vm2852_vm3, %v595_v31, inf  ;;  %v603_v34 = vsel %vm2852_vm3, %v596_v32, inf }
 0x104   : > { %601 = vmin.xlane.f32.xlu1 %v600_v33 }
 0x108   : > { %604 = vmin.xlane.f32.xlu1 %v603_v34 }
 0x191   : > { %v602_v36 = vpop.xlane.xlu1 %601 }
 0x192   : > { %vm606_vm4 = vcmp.le.f32.partialorder %v595_v31, %v602_v36 }
 0x193   : > { %v608_v37 = vsel %vm606_vm4, %v2490_v35, 16 }
 0x194   : > { %v610_v38 = vsel %vm2852_vm3, %v608_v37, 2147483647 }
 0x195   : > { %v605_v39 = vpop.xlane.xlu1 %604  ;;  %v612_v40 = vshra.s32 %v610_v38, 16  ;;  %v611_v46 = vand.u32 65535, %v610_v38 }
 0x196   : > { %vm607_vm5 = vcmp.le.f32.partialorder %v596_v32, %v605_v39 }
 0x197   : > { %v609_v41 = vsel %vm607_vm5, %v2490_v35, 16  ;;  %v614_v42 = vcvt.s32.f32 %v612_v40  ;;  %v613_v48 = vcvt.s32.f32 %v611_v46 }
 0x198   : > { %v625_v43 = vsel %vm2852_vm3, %v609_v41, 2147483647 }
 0x199   : > { %615 = vmin.xlane.f32.xlu0 %v614_v42  ;;  %v627_v44 = vshra.s32 %v625_v43, 16  ;;  %v626_v49 = vand.u32 65535, %v625_v43 }
 0x19b   : > { %v629_v45 = vcvt.s32.f32 %v627_v44  ;;  %v628_v52 = vcvt.s32.f32 %v626_v49 }
 0x19d   : > { %630 = vmin.xlane.f32.xlu1 %v629_v45 }
 0x226   : > { %v616_v47 = vpop.xlane.xlu0 %615 }
 0x227   : > { %vm617_vm6 = vcmp.eq.f32.partialorder %v614_v42, %v616_v47  ;;  %v622_v54 = vcvt.f32.s32 %v616_v47 }
 0x228   : > { %v618_v50 = vsel %vm617_vm6, %v613_v48, inf }
 0x229   : > { %619 = vmin.xlane.f32.xlu0 %v618_v50  ;;  %v623_v56 = vshll.u32 %v622_v54, 16 }
 0x22a   : > { %v631_v51 = vpop.xlane.xlu1 %630 }
 0x22b   : > { %vm632_vm7 = vcmp.eq.f32.partialorder %v629_v45, %v631_v51  ;;  %v637_v57 = vcvt.f32.s32 %v631_v51 }
 0x22c   : > { %v633_v53 = vsel %vm632_vm7, %v628_v52, inf }
 0x22d   : > { %634 = vmin.xlane.f32.xlu1 %v633_v53  ;;  %v638_v61 = vshll.u32 %v637_v57, 16 }
 0x2b6   : > { %v620_v55 = vpop.xlane.xlu0 %619 }
 0x2b7   : > { %v621_v58 = vcvt.f32.s32 %v620_v55 }
 0x2b9   : > { %v2496_v59 = vadd.s32 %v623_v56, %v621_v58 }
 0x2ba   : > { %v635_v60 = vpop.xlane.xlu1 %634 }
 0x2bb   : > { %v636_v62 = vcvt.f32.s32 %v635_v60  ;;  %vm640_vm8 = vcmp.eq.s32.totalorder %v2490_v35, %v2496_v59 }
 0x2bc   : > { %v642_v63 = vsel %vm640_vm8, inf, %v595_v31 }
 0x2bd   : > { %v2503_v0 = vadd.s32 %v638_v61, %v636_v62  ;;  %v644_v1 = vsel %vm2852_vm3, %v642_v63, inf }
 0x2be   : > { %645 = vmin.xlane.f32.xlu0 %v644_v1 }
 0x2bf   : > { %vm641_vm9 = vcmp.eq.s32.totalorder %v2490_v35, %v2503_v0 }
 0x2c0   : > { %v643_v3 = vsel %vm641_vm9, inf, %v596_v32 }
 0x2c1   : > { %v647_v4 = vsel %vm2852_vm3, %v643_v3, inf }
 0x2c2   : > { %648 = vmin.xlane.f32.xlu1 %v647_v4 }
 0x34b   : > { %v646_v5 = vpop.xlane.xlu0 %645 }
 0x34c   : > { %vm650_vm10 = vcmp.le.f32.partialorder %v642_v63, %v646_v5 }
 0x34d   : > { %v652_v8 = vsel %vm650_vm10, %v2490_v35, 16 }
 0x34e   : > { %v654_v9 = vsel %vm2852_vm3, %v652_v8, 2147483647 }
 0x34f   : > { %v649_v11 = vpop.xlane.xlu1 %648  ;;  %v656_v12 = vshra.s32 %v654_v9, 16  ;;  %v655_v18 = vand.u32 65535, %v654_v9 }
 0x350   : > { %vm651_vm11 = vcmp.le.f32.partialorder %v643_v3, %v649_v11 }
 0x351   : > { %v653_v13 = vsel %vm651_vm11, %v2490_v35, 16  ;;  %v658_v14 = vcvt.s32.f32 %v656_v12  ;;  %v657_v20 = vcvt.s32.f32 %v655_v18 }
 0x352   : > { %v669_v15 = vsel %vm2852_vm3, %v653_v13, 2147483647 }
 0x353   : > { %659 = vmin.xlane.f32.xlu0 %v658_v14  ;;  %v671_v16 = vshra.s32 %v669_v15, 16  ;;  %v670_v21 = vand.u32 65535, %v669_v15 }
 0x355   : > { %v673_v17 = vcvt.s32.f32 %v671_v16  ;;  %v672_v24 = vcvt.s32.f32 %v670_v21 }
 0x357   : > { %674 = vmin.xlane.f32.xlu1 %v673_v17 }
 0x3e0   : > { %v660_v19 = vpop.xlane.xlu0 %659 }
 0x3e1   : > { %vm661_vm12 = vcmp.eq.f32.partialorder %v658_v14, %v660_v19  ;;  %v666_v26 = vcvt.f32.s32 %v660_v19 }
 0x3e2   : > { %v662_v22 = vsel %vm661_vm12, %v657_v20, inf }
 0x3e3   : > { %663 = vmin.xlane.f32.xlu0 %v662_v22  ;;  %v667_v28 = vshll.u32 %v666_v26, 16 }
 0x3e4   : > { %v675_v23 = vpop.xlane.xlu1 %674 }
 0x3e5   : > { %vm676_vm13 = vcmp.eq.f32.partialorder %v673_v17, %v675_v23  ;;  %v681_v29 = vcvt.f32.s32 %v675_v23 }
 0x3e6   : > { %v677_v25 = vsel %vm676_vm13, %v672_v24, inf }
 0x3e7   : > { %678 = vmin.xlane.f32.xlu1 %v677_v25  ;;  %v682_v33 = vshll.u32 %v681_v29, 16 }
 0x470   : > { %v664_v27 = vpop.xlane.xlu0 %663 }
 0x471   : > { %v665_v30 = vcvt.f32.s32 %v664_v27 }
 0x473   : > { %v2516_v31 = vadd.s32 %v667_v28, %v665_v30 }
 0x474   : > { %v679_v32 = vpop.xlane.xlu1 %678 }
 0x475   : > { %vm684_vm14 = vcmp.eq.s32.totalorder %v2490_v35, %v2516_v31  ;;  %v680_v34 = vcvt.f32.s32 %v679_v32 }
 0x476   : > { %v1923_v36 = vsel %vm684_vm14, 1.0, %v2324_v2  ;;  %v686_v37 = vsel %vm684_vm14, inf, %v642_v63 }
 0x477   : > { %v2527_v38 = vadd.s32 %v682_v33, %v680_v34  ;;  %2047 = vmatprep.mubr.msk.f32.mxu0 %vm2852_vm3, %v1923_v36  ;;  %v773_v39 = vsel %vm2852_vm3, %v686_v37, inf }
 0x478   : > { %774 = vmin.xlane.f32.xlu0 %v773_v39 }
 0x479   : > { %vm685_vm15 = vcmp.eq.s32.totalorder %v2490_v35, %v2527_v38 }
 0x47a   : > { %v1924_v40 = vsel %vm685_vm15, 1.0, %v2324_v2  ;;  %v687_v41 = vsel %vm685_vm15, inf, %v643_v3 }
 0x47b   : > { %2048 = vmatmul.mubr.msk.f32.vlgmr.msra.gmra.mrb[2].mxu0 %vm2852_vm3, %v1924_v40  ;;  %v776_v42 = vsel %vm2852_vm3, %v687_v41, inf }
 0x47c   : > { %777 = vmin.xlane.f32.xlu1 %v776_v42  ;;  %2136 = vmatpush3.bf16.msra.mxu0 %v2462_v7 }
 0x47d   : > { %2138 = vmatprep.subr.bf16.mxu0 %v2462_v7 }
 0x505   : > { %v775_v43 = vpop.xlane.xlu0 %774 }
 0x506   : > { %vm779_vm0 = vcmp.le.f32.partialorder %v686_v37, %v775_v43 }
 0x507   : > { %v781_v44 = vsel %vm779_vm0, %v2490_v35, 16  ;;  %vm1215_vm0 = vcmask 1041408  }
 0x508   : > { %v783_v45 = vsel %vm2852_vm3, %v781_v44, 2147483647 }
 0x509   : > { %v778_v46 = vpop.xlane.xlu1 %777  ;;  %v785_v47 = vshra.s32 %v783_v45, 16  ;;  %v784_v55 = vand.u32 65535, %v783_v45 }
 0x50a   : > { %vm780_vm2 = vcmp.le.f32.partialorder %v687_v41, %v778_v46 }
 0x50b   : > { %v782_v48 = vsel %vm780_vm2, %v2490_v35, 16  ;;  %v787_v49 = vcvt.s32.f32 %v785_v47  ;;  %v786_v57 = vcvt.s32.f32 %v784_v55  ;;  %vm2327_vm2 = vmmov 1  }
 0x50c   : > { %v798_v50 = vsel %vm2852_vm3, %v782_v48, 2147483647 }
 0x50d   : > { %788 = vmin.xlane.f32.xlu0 %v787_v49  ;;  %v800_v51 = vshra.s32 %v798_v50, 16  ;;  %v799_v58 = vand.u32 65535, %v798_v50 }
 0x50f   : > { %v802_v52 = vcvt.s32.f32 %v800_v51  ;;  %v801_v62 = vcvt.s32.f32 %v799_v58  ;;  %v1182_v58 = vld [vmem:[%s2845_s3 + $0x8] sm:$0x3] }
 0x511   : > { %803 = vmin.xlane.f32.xlu1 %v802_v52 }
 0x54e   : > { %v2548_v53 = vpop.f32.mrb[2].mxu0 }
 0x54f   : > { %v2550_v54 = vpop.f32.mrb[3].mxu0  ;;  %v1044_v40 = vsub.f32 %v2466_v10, %v2548_v53 }
 0x550   : > { %v1043_v34 = vsub.f32 %v2460_v6, %v2550_v54 }
 0x551   : > { %v1046_v46 = vmul.f32 %v1044_v40, %v1044_v40 }
 0x552   : > { %v1045_v43 = vmul.f32 %v1043_v34, %v1043_v34 }
 0x554   : > { %v1047_v48 = vsel %vm410_vm1, %v1045_v43, 0.0 }
 0x59a   : > { %v789_v56 = vpop.xlane.xlu0 %788 }
 0x59b   : > { %vm790_vm4 = vcmp.eq.f32.partialorder %v787_v49, %v789_v56  ;;  %v795_v1 = vcvt.f32.s32 %v789_v56 }
 0x59c   : > { %v791_v60 = vsel %vm790_vm4, %v786_v57, inf  ;;  %v1181_v57 = vld [vmem:[%s2845_s3] sm:$0xff]  ;;  %vm2601_vm4 = vmpackc.low %vm1215_vm0, %vm2327_vm2 }
 0x59d   : > { %792 = vmin.xlane.f32.xlu0 %v791_v60  ;;  %v796_v4 = vshll.u32 %v795_v1, 16  ;;  %v2141_v60 = vpack.c.bf16 %v1182_v58, %v1181_v57 }
 0x59e   : > { %v804_v61 = vpop.xlane.xlu1 %803 }
 0x59f   : > { %vm805_vm5 = vcmp.eq.f32.partialorder %v802_v52, %v804_v61  ;;  %v810_v5 = vcvt.f32.s32 %v804_v61  ;;  %v1050_v52 = vsel %vm410_vm1, %v1046_v46, 0.0  ;;  %2143 = vmatprep.subr.msk.bf16.mxu1 %vm2601_vm4, %v2141_v60 }
 0x5a0   : > { %v806_v63 = vsel %vm805_vm5, %v801_v62, inf  ;;  %2146 = vmatpush3.bf16.msk.msra.mxu1 %vm2601_vm4, %v2141_v60 }
 0x5a1   : > { %807 = vmin.xlane.f32.xlu1 %v806_v63  ;;  %v811_v12 = vshll.u32 %v810_v5, 16 }
 0x62a   : > { %v793_v3 = vpop.xlane.xlu0 %792 }
 0x62b   : > { %v794_v8 = vcvt.f32.s32 %v793_v3 }
 0x62d   : > { %v2552_v9 = vadd.s32 %v796_v4, %v794_v8 }
 0x62e   : > { %v808_v11 = vpop.xlane.xlu1 %807 }
 0x62f   : > { %vm813_vm6 = vcmp.eq.s32.totalorder %v2490_v35, %v2552_v9  ;;  %v809_v13 = vcvt.f32.s32 %v808_v11 }
 0x630   : > { %v1927_v14 = vsel %vm813_vm6, 1.0, %v2324_v2  ;;  %v815_v15 = vsel %vm813_vm6, inf, %v686_v37 }
 0x631   : > { %v2563_v16 = vadd.s32 %v811_v12, %v809_v13  ;;  %2054 = vmatprep.mubr.msk.f32.mxu0 %vm2852_vm3, %v1927_v14  ;;  %v902_v17 = vsel %vm2852_vm3, %v815_v15, inf }
 0x632   : > { %903 = vmin.xlane.f32.xlu0 %v902_v17 }
 0x633   : > { %vm814_vm7 = vcmp.eq.s32.totalorder %v2490_v35, %v2563_v16 }
 0x634   : > { %v1928_v18 = vsel %vm814_vm7, 1.0, %v2324_v2  ;;  %v816_v19 = vsel %vm814_vm7, inf, %v687_v41 }
 0x635   : > { %2055 = vmatmul.mubr.msk.f32.vlgmr.msra.gmra.mrb[4].mxu0 %vm2852_vm3, %v1928_v18  ;;  %v905_v20 = vsel %vm2852_vm3, %v816_v19, inf }
 0x636   : > { %906 = vmin.xlane.f32.xlu1 %v905_v20  ;;  %2140 = vmatpush3.bf16.msra.mxu0 %v2462_v7 }
 0x6bf   : > { %v904_v21 = vpop.xlane.xlu0 %903 }
 0x6c0   : > { %vm908_vm10 = vcmp.le.f32.partialorder %v815_v15, %v904_v21 }
 0x6c1   : > { %v910_v22 = vsel %vm908_vm10, %v2490_v35, 16 }
 0x6c2   : > { %v912_v23 = vsel %vm2852_vm3, %v910_v22, 2147483647 }
 0x6c3   : > { %v907_v24 = vpop.xlane.xlu1 %906  ;;  %v914_v25 = vshra.s32 %v912_v23, 16  ;;  %v913_v33 = vand.u32 65535, %v912_v23 }
 0x6c4   : > { %vm909_vm11 = vcmp.le.f32.partialorder %v816_v19, %v907_v24 }
 0x6c5   : > { %v911_v26 = vsel %vm909_vm11, %v2490_v35, 16  ;;  %v916_v27 = vcvt.s32.f32 %v914_v25  ;;  %v915_v37 = vcvt.s32.f32 %v913_v33  ;;  %vm1037_vm11 = vcmask 48128  }
 0x6c6   : > { %v927_v28 = vsel %vm2852_vm3, %v911_v26, 2147483647 }
 0x6c7   : > { %917 = vmin.xlane.f32.xlu0 %v916_v27  ;;  %v929_v29 = vshra.s32 %v927_v28, 16  ;;  %v928_v39 = vand.u32 65535, %v927_v28 }
 0x6c9   : > { %v931_v30 = vcvt.s32.f32 %v929_v29  ;;  %v930_v45 = vcvt.s32.f32 %v928_v39 }
 0x6cb   : > { %932 = vmin.xlane.f32.xlu1 %v931_v30 }
 0x708   : > { %v2056_v32 = vpop.f32.mrb[4].mxu0 }
 0x709   : > { %v893_v7 = vpop.f32.mrb[5].mxu0  ;;  %v1090_v47 = vsub.f32 %v2466_v10, %v2056_v32 }
 0x70a   : > { %v1089_v41 = vsub.f32 %v2460_v6, %v893_v7 }
 0x70b   : > { %v1092_v55 = vmul.f32 %v1090_v47, %v1090_v47 }
 0x70c   : > { %v1091_v50 = vmul.f32 %v1089_v41, %v1089_v41 }
 0x70d   : > { %v1096_v56 = vsel %vm410_vm1, %v1092_v55, 0.0 }
 0x70e   : > { %v1093_v51 = vsel %vm410_vm1, %v1091_v50, 0.0 }
 0x754   : > { %v918_v36 = vpop.xlane.xlu0 %917 }
 0x755   : > { %vm919_vm12 = vcmp.eq.f32.partialorder %v916_v27, %v918_v36  ;;  %v924_v62 = vcvt.f32.s32 %v918_v36 }
 0x756   : > { %v920_v42 = vsel %vm919_vm12, %v915_v37, inf  ;;  %vm1040_vm12 = vcmask 72704  }
 0x757   : > { %921 = vmin.xlane.f32.xlu0 %v920_v42  ;;  %v925_v1 = vshll.u32 %v924_v62, 16 }
 0x758   : > { %v933_v44 = vpop.xlane.xlu1 %932 }
 0x759   : > { %vm934_vm13 = vcmp.eq.f32.partialorder %v931_v30, %v933_v44 }
 0x75a   : > { %v935_v49 = vsel %vm934_vm13, %v930_v45, inf  ;;  %vm1190_vm13 = vcmask 80896  }
 0x75b   : > { %1048 = vadd.xlane.f32.xlu0 %v1047_v48  ;;  %936 = vmin.xlane.f32.xlu1 %v935_v49 }
 0x75f   : > { %1094 = vadd.xlane.f32.xlu0 %v1093_v51  ;;  %1051 = vadd.xlane.f32.xlu1 %v1050_v52 }
 0x763   : > { %1097 = vadd.xlane.f32.xlu1 %v1096_v56 }
 0x774   : > { %1031 = vrot.lane.b32.xlu1 %v2466_v10, %s2326_s24 }
 0x775   : > { %1029 = vrot.lane.b32.xlu0 %v2460_v6, %s2326_s24 }
 0x778   : > { %1069 = vrot.lane.b32.xlu1 %v2550_v54, %s2326_s24  ;;  %v939_v54 = vcvt.f32.s32 %v933_v44 }
 0x779   : > { %1077 = vrot.lane.b32.xlu0 %v1043_v34, %s2328_s26 }
 0x77c   : > { %1071 = vrot.lane.b32.xlu1 %v2548_v53, %s2326_s24  ;;  %v940_v53 = vshll.u32 %v939_v54, 16 }
 0x77d   : > { %1115 = vrot.lane.b32.xlu0 %v893_v7, %s2326_s24 }
 0x780   : > { %1079 = vrot.lane.b32.xlu1 %v1044_v40, %s2328_s26 }
 0x781   : > { %1123 = vrot.lane.b32.xlu0 %v1089_v41, %s2328_s26 }
 0x784   : > { %1117 = vrot.lane.b32.xlu1 %v2056_v32, %s2326_s24 }
 0x788   : > { %1125 = vrot.lane.b32.xlu1 %v1090_v47, %s2328_s26 }
 0x7e4   : > { %v922_v63 = vpop.xlane.xlu0 %921 }
 0x7e5   : > { %v923_v3 = vcvt.f32.s32 %v922_v63 }
 0x7e7   : > { %v2621_v4 = vadd.s32 %v925_v1, %v923_v3 }
 0x7e8   : > { %v1049_v5 = vpop.xlane.xlu0 %1048  ;;  %v937_v8 = vpop.xlane.xlu1 %936 }
 0x7e9   : > { %2230 = vrsqrt.f32 %v1049_v5  ;;  %v938_v11 = vcvt.f32.s32 %v937_v8  ;;  %vm942_vm5 = vcmp.eq.s32.totalorder %v2490_v35, %v2621_v4  ;;  %vm1055_vm0 = vcmp.eq.f32.partialorder %v1049_v5, inf }
 0x7ea   : > { %v1931_v12 = vsel %vm942_vm5, 1.0, %v2324_v2  ;;  %v1058_v34 = vand.u32 2147483648, %v1049_v5  ;;  %vm1057_vm2 = vcmp.eq.f32.partialorder %v1049_v5, 0.0 }
 0x7eb   : > { %v2629_v13 = vadd.s32 %v940_v53, %v938_v11  ;;  %2061 = vmatprep.mubr.msk.f32.mxu0 %vm2852_vm3, %v1931_v12 }
 0x7ec   : > { %v1095_v14 = vpop.xlane.xlu0 %1094  ;;  %v1052_v15 = vpop.xlane.xlu1 %1051 }
 0x7ed   : > { %vm2853_vm10 = vcmp.eq.s32.totalorder %v2490_v35, %v2629_v13  ;;  %2232 = vrsqrt.f32 %v1095_v14  ;;  %v1065_v48 = vand.u32 2147483648, %v1052_v15  ;;  %v1104_v55 = vand.u32 2147483648, %v1095_v14 }
 0x7ee   : > { %v1932_v17 = vsel %vm2853_vm10, 1.0, %v2324_v2  ;;  %2234 = vrsqrt.f32 %v1052_v15  ;;  %vm1103_vm10 = vcmp.eq.f32.partialorder %v1095_v14, 0.0 }
 0x7ef   : > { %2062 = vmatmul.mubr.msk.f32.vlgmr.msra.gmra.mrb[6].mxu0 %vm2852_vm3, %v1932_v17  ;;  %vm1101_vm3 = vcmp.eq.f32.partialorder %v1095_v14, inf }
 0x7f0   : > { %v1030_v18 = vpop.permute.xlu0 %1029  ;;  %v2639_v19 = vpop.xlane.xlu1 %1097 }
 0x7f1   : > { %v1035_v20 = vsel %vm410_vm1, %v2460_v6, %v1030_v18  ;;  %2236 = vrsqrt.f32 %v2639_v19  ;;  %v1111_v3 = vand.u32 2147483648, %v2639_v19 }
 0x7f2   : > { %v1038_v21 = vsel %vm1037_vm11, %v1035_v20, 0.0  ;;  %v2692_v20 = vld [vmem:[%s2846_s4] ss:$0 sm:$0xff] }
 0x7f3   : > { %v2231_v22 = vpop.eup %2230  ;;  %v1041_v23 = vsel %vm1040_vm12, %v1038_v21, 0.0 }
 0x7f4   : > { %v1054_v24 = vmul.f32 %v2231_v22, %v1049_v5  ;;  %v1078_v25 = vpop.permute.xlu0 %1077  ;;  %v1032_v2 = vpop.permute.xlu1 %1031  ;;  %2068 = vmatprep.mubr.msk.f32.mxu1 %vm1190_vm13, %v1041_v23 }
 0x7f5   : > { %v1036_v26 = vsel %vm410_vm1, %v2466_v10, %v1032_v2 }
 0x7f6   : > { %v1039_v27 = vsel %vm1037_vm11, %v1036_v26, 0.0  ;;  %v1056_v30 = vsel %vm1055_vm0, %v1049_v5, %v1054_v24  ;;  %vm1062_vm0 = vcmp.eq.f32.partialorder %v1052_v15, inf }
 0x7f7   : > { %v2233_v28 = vpop.eup %2232  ;;  %v1042_v29 = vsel %vm1040_vm12, %v1039_v27, 0.0  ;;  %v1059_v40 = vsel %vm1057_vm2, %v1058_v34, %v1056_v30  ;;  %vm1064_vm2 = vcmp.eq.f32.partialorder %v1052_v15, 0.0 }
 0x7f8   : > { %v2235_v32 = vpop.eup %2234  ;;  %v1116_v7 = vpop.permute.xlu0 %1115  ;;  %2069 = vmatmul.mubr.msk.f32.vlgmr.msra.gmra.mrb[2].mxu1 %vm1190_vm13, %v1042_v29  ;;  %v1100_v41 = vmul.f32 %v2233_v28, %v1095_v14 }
 0x7f9   : > { %v1070_v33 = vpop.permute.xlu1 %1069  ;;  %v1061_v37 = vmul.f32 %v2235_v32, %v1052_v15  ;;  %v1129_v47 = vsel %vm410_vm1, %v2460_v6, %v1116_v7 }
 0x7fa   : > { %v1083_v36 = vsel %vm410_vm1, %v2460_v6, %v1070_v33  ;;  %v1102_v49 = vsel %vm1101_vm3, %v1095_v14, %v1100_v41  ;;  %vm1108_vm3 = vcmp.eq.f32.partialorder %v2639_v19, inf  ;;  %v1348_v14 = vld [vmem:[%s2847_s5] sm:$0xff] }
 0x7fb   : > { %v1085_v39 = vsel %vm1037_vm11, %v1083_v36, %v1078_v25  ;;  %v1063_v45 = vsel %vm1062_vm0, %v1052_v15, %v1061_v37  ;;  %v2237_v46 = vpop.eup %2236  ;;  %v1105_v62 = vsel %vm1103_vm10, %v1104_v55, %v1102_v49  ;;  %vm1110_vm0 = vcmp.eq.f32.partialorder %v2639_v19, 0.0  ;;  %v1349_v15 = vld [vmem:[%s2847_s5 + $0x8] sm:$0x3] }
 0x7fc   : > { %v1087_v42 = vsel %vm1040_vm12, %v1085_v39, %v1059_v40  ;;  %v1124_v44 = vpop.permute.xlu0 %1123  ;;  %v1066_v57 = vsel %vm1064_vm2, %v1065_v48, %v1063_v45  ;;  %v1107_v58 = vmul.f32 %v2237_v46, %v2639_v19  ;;  %v2147_v17 = vpack.c.bf16 %v1349_v15, %v1348_v14  ;;  %v1514_v55 = vld [vmem:[%s2849_s7 + $0x8] sm:$0x3] }
 0x7fd   : > { %2071 = vmatprep.mubr.msk.f32.mxu1 %vm1190_vm13, %v1087_v42  ;;  %v1072_v43 = vpop.permute.xlu1 %1071  ;;  %v1131_v50 = vsel %vm1037_vm11, %v1129_v47, %v1124_v44 }
 0x7fe   : > { %v1084_v51 = vsel %vm410_vm1, %v2466_v10, %v1072_v43  ;;  %v1133_v63 = vsel %vm1040_vm12, %v1131_v50, %v1105_v62  ;;  %v1109_v54 = vsel %vm1108_vm3, %v2639_v19, %v1107_v58  ;;  %2149 = vmatprep.subr.msk.bf16.mxu0 %vm2601_vm4, %v2147_v17 }
 0x7ff   : > { %v1112_v11 = vsel %vm1110_vm0, %v1111_v3, %v1109_v54  ;;  %2152 = vmatpush3.bf16.msk.msra.mxu0 %vm2601_vm4, %v2147_v17 }
 0x801   : > { %v1080_v52 = vpop.permute.xlu1 %1079 }
 0x802   : > { %v1086_v56 = vsel %vm1037_vm11, %v1084_v51, %v1080_v52  ;;  %v1513_v52 = vld [vmem:[%s2849_s7] sm:$0xff] }
 0x803   : > { %v1088_v60 = vsel %vm1040_vm12, %v1086_v56, %v1066_v57  ;;  %v2153_v56 = vpack.c.bf16 %v1514_v55, %v1513_v52 }
 0x804   : > { %2072 = vmatmul.mubr.msk.f32.gmra.mrb[4].mxu1 %vm1190_vm13, %v1088_v60 }
 0x805   : > { %2074 = vmatprep.mubr.msk.f32.mxu1 %vm1190_vm13, %v1133_v63  ;;  %v1118_v1 = vpop.permute.xlu1 %1117  ;;  %2155 = vmatprep.subr.msk.bf16.mxu1 %vm2601_vm4, %v2153_v56 }
 0x806   : > { %v1130_v5 = vsel %vm410_vm1, %v2466_v10, %v1118_v1  ;;  %2158 = vmatpush3.bf16.msk.msra.mxu1 %vm2601_vm4, %v2153_v56 }
 0x809   : > { %v1126_v8 = vpop.permute.xlu1 %1125 }
 0x80a   : > { %v1132_v53 = vsel %vm1037_vm11, %v1130_v5, %v1126_v8 }
 0x80b   : > { %v1134_v12 = vsel %vm1040_vm12, %v1132_v53, %v1112_v11 }
 0x80c   : > { %2075 = vmatmul.mubr.msk.f32.gmra.mrb[6].mxu1 %vm1190_vm13, %v1134_v12 }
 0x8c2   : > { %v2063_v18 = vpop.f32.mrb[6].mxu0 }
 0x8c3   : > { %1163 = vrot.lane.b32.xlu1 %v2063_v18, %s2326_s24  ;;  %v1020_v19 = vpop.f32.mrb[7].mxu0  ;;  %v1136_v37 = vsub.f32 %v2466_v10, %v2063_v18 }
 0x8c4   : > { %1161 = vrot.lane.b32.xlu0 %v1020_v19, %s2326_s24  ;;  %v1135_v33 = vsub.f32 %v2460_v6, %v1020_v19 }
 0x8c5   : > { %v1138_v46 = vmul.f32 %v1136_v37, %v1136_v37 }
 0x8c6   : > { %v1137_v41 = vmul.f32 %v1135_v33, %v1135_v33 }
 0x8c7   : > { %v1142_v51 = vsel %vm410_vm1, %v1138_v46, 0.0 }
 0x8c8   : > { %v1139_v48 = vsel %vm410_vm1, %v1137_v41, 0.0 }
 0x8cb   : > { %v2070_v21 = vpop.f32.mrb[2].mxu1 }
 0x8cc   : > { %v1291_v22 = vadd.f32 %v2070_v21, %v2692_v20  ;;  %v1285_v23 = vpop.f32.mrb[3].mxu1 }
 0x8cd   : > { %v1286_v24 = vadd.f32 %v2692_v20, %v1285_v23  ;;  %v2735_v23 = vld [vmem:[%s2848_s6] ss:$0 sm:$0xff] }
 0x8ce   : > { %vm1325_vm10 = vcmp.gt.f32.partialorder %v1291_v22, 0.0  ;;  %v1333_v25 = vmul.f32 0.2, %v1291_v22 }
 0x8cf   : > { %vm1324_vm2 = vcmp.gt.f32.partialorder %v1286_v24, 0.0  ;;  %v1332_v2 = vmul.f32 0.2, %v1286_v24 }
 0x8d0   : > { %v1341_v26 = vsel %vm1325_vm10, %v1291_v22, %v1333_v25 }
 0x8d1   : > { %v1340_v27 = vsel %vm1324_vm2, %v1286_v24, %v1332_v2 }
 0x8d2   : > { %2084 = vmatprep.mubr.msk.f32.mxu0 %vm1190_vm13, %v1340_v27 }
 0x8d3   : > { %2085 = vmatmul.mubr.msk.f32.vlgmr.msra.gmra.mrb[8].mxu0 %vm1190_vm13, %v1341_v26 }
 0x8d7   : > { %v2073_v28 = vpop.f32.mrb[4].mxu1 }
 0x8d8   : > { %v1301_v29 = vadd.f32 %v2073_v28, %v2692_v20  ;;  %v1295_v30 = vpop.f32.mrb[5].mxu1 }
 0x8d9   : > { %v1296_v32 = vadd.f32 %v2692_v20, %v1295_v30 }
 0x8da   : > { %v1335_v7 = vmul.f32 0.2, %v1301_v29  ;;  %vm1327_vm3 = vcmp.gt.f32.partialorder %v1301_v29, 0.0 }
 0x8db   : > { %vm1326_vm0 = vcmp.gt.f32.partialorder %v1296_v32, 0.0  ;;  %v1334_v34 = vmul.f32 0.2, %v1296_v32 }
 0x8dc   : > { %v1343_v39 = vsel %vm1327_vm3, %v1301_v29, %v1335_v7 }
 0x8dd   : > { %v1342_v36 = vsel %vm1326_vm0, %v1296_v32, %v1334_v34 }
 0x8de   : > { %2087 = vmatprep.mubr.msk.f32.mxu0 %vm1190_vm13, %v1342_v36 }
 0x8df   : > { %v2076_v40 = vpop.f32.mrb[6].mxu1  ;;  %2088 = vmatmul.mubr.msk.f32.gmra.mrb[10].mxu0 %vm1190_vm13, %v1343_v39 }
 0x8e0   : > { %v1311_v42 = vadd.f32 %v2076_v40, %v2692_v20  ;;  %v1305_v43 = vpop.f32.mrb[7].mxu1 }
 0x8e1   : > { %v1306_v44 = vadd.f32 %v2692_v20, %v1305_v43 }
 0x8e2   : > { %v1337_v45 = vmul.f32 0.2, %v1311_v42  ;;  %vm1329_vm10 = vcmp.gt.f32.partialorder %v1311_v42, 0.0 }
 0x8e3   : > { %vm1328_vm2 = vcmp.gt.f32.partialorder %v1306_v44, 0.0  ;;  %v1336_v47 = vmul.f32 0.2, %v1306_v44  ;;  %1140 = vadd.xlane.f32.xlu0 %v1139_v48  ;;  %v2329_v48 = vmov 0  }
 0x8e4   : > { %v1345_v50 = vsel %vm1329_vm10, %v1311_v42, %v1337_v45  ;;  %2228 = vset.pattern.permute.xlu1 %v2329_v48  ;;  %2229 = vset.pattern.permute.xlu0 %v2329_v48 }
 0x8e5   : > { %v1344_v49 = vsel %vm1328_vm2, %v1306_v44, %v1336_v47 }
 0x8e6   : > { %2090 = vmatprep.mubr.msk.f32.mxu0 %vm1190_vm13, %v1344_v49 }
 0x8e7   : > { %2091 = vmatmul.mubr.msk.f32.gmra.mrb[12].mxu0 %vm1190_vm13, %v1345_v50  ;;  %1143 = vadd.xlane.f32.xlu1 %v1142_v51 }
 0x8f8   : > { %1171 = vrot.lane.b32.xlu1 %v1136_v37, %s2328_s26 }
 0x8f9   : > { %1169 = vrot.lane.b32.xlu0 %v1135_v33, %s2328_s26  ;;  %s2794_s26 = scalar_lea.hbm %s2851_s9, %s1975_s19 }
 0x935   : > { %v1164_v58 = vpop.permute.xlu1 %1163 }
 0x936   : > { %v1162_v57 = vpop.permute.xlu0 %1161  ;;  %v1176_v18 = vsel %vm410_vm1, %v2466_v10, %v1164_v58 }
 0x937   : > { %v1175_v5 = vsel %vm410_vm1, %v2460_v6, %v1162_v57 }
 0x970   : > { %v1141_v60 = vpop.xlane.xlu0 %1140 }
 0x971   : > { %2238 = vrsqrt.f32 %v1141_v60  ;;  %vm1147_vm3 = vcmp.eq.f32.partialorder %v1141_v60, inf  ;;  %v1150_v3 = vand.u32 2147483648, %v1141_v60  ;;  %vm1149_vm0 = vcmp.eq.f32.partialorder %v1141_v60, 0.0 }
 0x974   : > { %v1144_v62 = vpop.xlane.xlu1 %1143  ;;  %v1170_v54 = vpop.permute.xlu0 %1169 }
 0x975   : > { %2240 = vrsqrt.f32 %v1144_v62  ;;  %v1177_v61 = vsel %vm1037_vm11, %v1175_v5, %v1170_v54  ;;  %vm1154_vm4 = vcmp.eq.f32.partialorder %v1144_v62, inf  ;;  %v1157_v17 = vand.u32 2147483648, %v1144_v62 }
 0x976   : > { %vm1156_vm10 = vcmp.eq.f32.partialorder %v1144_v62, 0.0 }
 0x978   : > { %v1172_v14 = vpop.permute.xlu1 %1171 }
 0x979   : > { %v1178_v6 = vsel %vm1037_vm11, %v1176_v18, %v1172_v14 }
 0x97b   : > { %v2239_v63 = vpop.eup %2238 }
 0x97c   : > { %v1146_v1 = vmul.f32 %v2239_v63, %v1141_v60 }
 0x97e   : > { %v1148_v8 = vsel %vm1147_vm3, %v1141_v60, %v1146_v1  ;;  %v1955_v60 = vld [vmem:[#allocation2] ss:$0 sm:$0xff] }
 0x97f   : > { %v2241_v53 = vpop.eup %2240  ;;  %v1151_v11 = vsel %vm1149_vm0, %v1150_v3, %v1148_v8 }
 0x980   : > { %v1153_v12 = vmul.f32 %v2241_v53, %v1144_v62  ;;  %v1179_v15 = vsel %vm1040_vm12, %v1177_v61, %v1151_v11 }
 0x981   : > { %2077 = vmatprep.mubr.msk.f32.mxu1 %vm1190_vm13, %v1179_v15 }
 0x982   : > { %v1155_v19 = vsel %vm1154_vm4, %v1144_v62, %v1153_v12 }
 0x983   : > { %v1158_v21 = vsel %vm1156_vm10, %v1157_v17, %v1155_v19 }
 0x984   : > { %v1180_v22 = vsel %vm1040_vm12, %v1178_v6, %v1158_v21 }
 0x985   : > { %2078 = vmatmul.mubr.msk.f32.gmra.mrb[8].mxu1 %vm1190_vm13, %v1180_v22 }
 0x9a6   : > { %v2086_v24 = vpop.f32.mrb[8].mxu0 }
 0x9a7   : > { %v1456_v25 = vadd.f32 %v2086_v24, %v2735_v23  ;;  %v1450_v2 = vpop.f32.mrb[9].mxu0  ;;  %v408_v24 = vld [vmem:[%s402_s30] sm:$0xff] }
 0x9a8   : > { %v1451_v10 = vadd.f32 %v2735_v23, %v1450_v2 }
 0x9a9   : > { %vm1490_vm1 = vcmp.gt.f32.partialorder %v1456_v25, 0.0  ;;  %v1498_v26 = vmul.f32 0.2, %v1456_v25 }
 0x9aa   : > { %vm1489_vm2 = vcmp.gt.f32.partialorder %v1451_v10, 0.0  ;;  %v1497_v27 = vmul.f32 0.2, %v1451_v10 }
 0x9ab   : > { %v1506_v28 = vsel %vm1490_vm1, %v1456_v25, %v1498_v26  ;;  %v409_v25 = vld [vmem:[%s402_s30 + $0x8] sm:$0xff]  ;;  %s2248_s30 = scalar_lea.vmem %s2247_s29, 512 }
 0x9ac   : > { %v1505_v29 = vsel %vm1489_vm2, %v1451_v10, %v1497_v27  ;;  %v2159_v2 = vpack.c.bf16 %v409_v25, %v408_v24  ;;  %p2250_p2 = scmp.lt.s32.totalorder %s2248_s30, %s2242_s28 }
 0x9ad   : > { %2100 = vmatprep.mubr.msk.f32.mxu1 %vm1190_vm13, %v1505_v29 }
 0x9ae   : > { %2101 = vmatmul.mubr.msk.f32.vlgmr.msra.gmra.mrb[10].mxu1 %vm1190_vm13, %v1506_v28  ;;  %2160 = vmatprep.subr.bf16.mxu0 %v2159_v2  ;;  %p2251_p3 = por %p2250_p2, %p2249_p1 }
 0x9af   : > { %2162 = vmatpush3.bf16.msra.mxu0 %v2159_v2 }
 0x9b0   : > { %p2252_p5 = pnand %p2251_p3, %p2245_p0 }
 0x9b2   : > { %v2089_v30 = vpop.f32.mrb[10].mxu0 }
 0x9b3   : > { %v1466_v32 = vadd.f32 %v2089_v30, %v2735_v23  ;;  %v1460_v7 = vpop.f32.mrb[11].mxu0 }
 0x9b4   : > { %v1461_v33 = vadd.f32 %v2735_v23, %v1460_v7 }
 0x9b5   : > { %v1500_v34 = vmul.f32 0.2, %v1466_v32  ;;  %vm1492_vm11 = vcmp.gt.f32.partialorder %v1466_v32, 0.0 }
 0x9b6   : > { %vm1491_vm12 = vcmp.gt.f32.partialorder %v1461_v33, 0.0  ;;  %v1499_v36 = vmul.f32 0.2, %v1461_v33 }
 0x9b7   : > { %v1508_v39 = vsel %vm1492_vm11, %v1466_v32, %v1500_v34 }
 0x9b8   : > { %v1507_v37 = vsel %vm1491_vm12, %v1461_v33, %v1499_v36 }
 0x9b9   : > { %2103 = vmatprep.mubr.msk.f32.mxu1 %vm1190_vm13, %v1507_v37 }
 0x9ba   : > { %v2092_v40 = vpop.f32.mrb[12].mxu0  ;;  %2104 = vmatmul.mubr.msk.f32.gmra.mrb[12].mxu1 %vm1190_vm13, %v1508_v39 }
 0x9bb   : > { %v1476_v41 = vadd.f32 %v2092_v40, %v2735_v23  ;;  %v1470_v42 = vpop.f32.mrb[13].mxu0 }
 0x9bc   : > { %v1471_v43 = vadd.f32 %v2735_v23, %v1470_v42 }
 0x9bd   : > { %v1502_v44 = vmul.f32 0.2, %v1476_v41  ;;  %vm1494_vm3 = vcmp.gt.f32.partialorder %v1476_v41, 0.0 }
 0x9be   : > { %vm1493_vm0 = vcmp.gt.f32.partialorder %v1471_v43, 0.0  ;;  %v1501_v45 = vmul.f32 0.2, %v1471_v43 }
 0x9bf   : > { %v1510_v47 = vsel %vm1494_vm3, %v1476_v41, %v1502_v44 }
 0x9c0   : > { %v1509_v46 = vsel %vm1493_vm0, %v1471_v43, %v1501_v45 }
 0x9c1   : > { %2106 = vmatprep.mubr.msk.f32.mxu1 %vm1190_vm13, %v1509_v46 }
 0x9c2   : > { %2107 = vmatmul.mubr.msk.f32.gmra.mrb[14].mxu1 %vm1190_vm13, %v1510_v47 }
 0xa58   : > { %v2079_v49 = vpop.f32.mrb[8].mxu1 }
 0xa59   : > { %v1321_v50 = vadd.f32 %v2079_v49, %v2692_v20  ;;  %v1315_v51 = vpop.f32.mrb[9].mxu1 }
 0xa5a   : > { %v1316_v52 = vadd.f32 %v2692_v20, %v1315_v51 }
 0xa5b   : > { %v1339_v55 = vmul.f32 0.2, %v1321_v50  ;;  %vm1331_vm4 = vcmp.gt.f32.partialorder %v1321_v50, 0.0 }
 0xa5c   : > { %vm1330_vm10 = vcmp.gt.f32.partialorder %v1316_v52, 0.0  ;;  %v1338_v56 = vmul.f32 0.2, %v1316_v52 }
 0xa5d   : > { %v1347_v58 = vsel %vm1331_vm4, %v1321_v50, %v1339_v55 }
 0xa5e   : > { %v1346_v57 = vsel %vm1330_vm10, %v1316_v52, %v1338_v56 }
 0xa5f   : > { %2093 = vmatprep.mubr.msk.f32.mxu0 %vm1190_vm13, %v1346_v57 }
 0xa60   : > { %2094 = vmatmul.mubr.msk.f32.gmra.mrb[14].mxu0 %vm1190_vm13, %v1347_v58 }
 0xa81   : > { %v2102_v62 = vpop.f32.mrb[10].mxu1 }
 0xa82   : > { %v1621_v63 = vadd.f32 %v2102_v62, %v1955_v60  ;;  %v1615_v1 = vpop.f32.mrb[11].mxu1 }
 0xa83   : > { %v1616_v54 = vadd.f32 %v1955_v60, %v1615_v1 }
 0xa84   : > { %1661 = vperm.xlu1 %2228, %v1621_v63  }
 0xa85   : > { %1656 = vperm.xlu0 %2229, %v1616_v54  }
 0xa8d   : > { %v2105_v3 = vpop.f32.mrb[12].mxu1 }
 0xa8e   : > { %v1631_v5 = vadd.f32 %v2105_v3, %v1955_v60  ;;  %v1625_v20 = vpop.f32.mrb[13].mxu1 }
 0xa8f   : > { %v1626_v8 = vadd.f32 %v1955_v60, %v1625_v20 }
 0xa90   : > { %1673 = vperm.xlu0 %2229, %v1631_v5  }
 0xa91   : > { %1668 = vperm.xlu1 %2228, %v1626_v8  }
 0xa95   : > { %v2108_v53 = vpop.f32.mrb[14].mxu1 }
 0xa96   : > { %v1641_v61 = vadd.f32 %v2108_v53, %v1955_v60  ;;  %v1635_v11 = vpop.f32.mrb[15].mxu1 }
 0xa97   : > { %v1636_v12 = vadd.f32 %v1955_v60, %v1635_v11 }
 0xa98   : > { %1685 = vperm.xlu0 %2229, %v1641_v61  }
 0xa99   : > { %1680 = vperm.xlu1 %2228, %v1636_v12  }
 0xb03   : > { %v1662_v29 = vpop.permute.xlu1 %1661 }
 0xb04   : > { %v1657_v28 = vpop.permute.xlu0 %1656  ;;  %v1665_v36 = vsel %vm641_vm9, %v1662_v29, 0.0  ;;  %vm2861_vm9 = vcmask 130048  }
 0xb05   : > { %v1664_v34 = vsel %vm640_vm8, %v1657_v28, 0.0  ;;  %vm2860_vm8 = vcmp.eq.s32.totalorder %v2490_v35, %v2629_v13 }
 0xb0f   : > { %v1674_v30 = vpop.permute.xlu0 %1673 }
 0xb10   : > { %v1669_v32 = vpop.permute.xlu1 %1668  ;;  %v1677_v40 = vsel %vm685_vm15, %v1674_v30, %v1665_v36 }
 0xb11   : > { %v1676_v37 = vsel %vm684_vm14, %v1669_v32, %v1664_v34  ;;  %vm2862_vm14 = vmmov %vm2861_vm9 }
 0xb17   : > { %v1686_v7 = vpop.permute.xlu0 %1685 }
 0xb18   : > { %v1681_v33 = vpop.permute.xlu1 %1680  ;;  %v1689_v0 = vsel %vm814_vm7, %v1686_v7, %v1677_v40 }
 0xb19   : > { %v1688_v41 = vsel %vm813_vm6, %v1681_v33, %v1676_v37 }
 0xb33   : > { %v2095_v14 = vpop.f32.mrb[14].mxu0 }
 0xb34   : > { %v1486_v15 = vadd.f32 %v2095_v14, %v2735_v23  ;;  %v1480_v17 = vpop.f32.mrb[15].mxu0 }
 0xb35   : > { %v1481_v18 = vadd.f32 %v2735_v23, %v1480_v17 }
 0xb36   : > { %v1504_v19 = vmul.f32 0.2, %v1486_v15  ;;  %vm1496_vm1 = vcmp.gt.f32.partialorder %v1486_v15, 0.0 }
 0xb37   : > { %vm1495_vm2 = vcmp.gt.f32.partialorder %v1481_v18, 0.0  ;;  %v1503_v6 = vmul.f32 0.2, %v1481_v18 }
 0xb38   : > { %v1512_v22 = vsel %vm1496_vm1, %v1486_v15, %v1504_v19 }
 0xb39   : > { %v1511_v21 = vsel %vm1495_vm2, %v1481_v18, %v1503_v6 }
 0xb3a   : > { %2109 = vmatprep.mubr.msk.f32.mxu1 %vm1190_vm13, %v1511_v21 }
 0xb3b   : > { %2110 = vmatmul.mubr.msk.f32.gmra.mrb[16].mxu1 %vm1190_vm13, %v1512_v22 }
 0xc0e   : > { %v2111_v23 = vpop.f32.mrb[16].mxu1 }
 0xc0f   : > { %v1651_v10 = vadd.f32 %v2111_v23, %v1955_v60  ;;  %v1645_v26 = vpop.f32.mrb[17].mxu1 }
 0xc10   : > { %v1646_v27 = vadd.f32 %v1955_v60, %v1645_v26 }
 0xc11   : > { %1697 = vperm.xlu0 %2229, %v1651_v10  }
 0xc12   : > { %1692 = vperm.xlu1 %2228, %v1646_v27  }
 0xc90   : > { %v1698_v39 = vpop.permute.xlu0 %1697 }
 0xc91   : > { %v1693_v59 = vpop.permute.xlu1 %1692  ;;  %v1701_v31 = vsel %vm2860_vm8, %v1698_v39, %v1689_v0 }
 0xc92   : > { %v1700_v42 = vsel %vm942_vm5, %v1693_v59, %v1688_v41 }
 0xc93   : > { %2116 = vmatprep.mubr.msk.f32.mxu0 %vm2861_vm9, %v1700_v42 }
 0xc94   : > { %2117 = vmatmul.mubr.msk.f32.vlgmr.msra.gmra.mrb[16].mxu0 %vm2862_vm14, %v1701_v31 }
 0xd67   : > { %v2118_v35 = vpop.f32.mrb[16].mxu0 }
 0xd68   : > { %1784 = vst [vmem:[%s382_s8 + $0x8] sm:$0xff] %v2118_v35  ;;  %v1774_v38 = vpop.f32.mrb[17].mxu0 }
 0xd69   : > { %1783 = vst [vmem:[%s382_s8] sm:$0xff] %v1774_v38 }
 0xd6a   : > { %2255 = shalt.err (!%p2252_p5)
}
 0xd6b   : > { %s2256_s25 = scalar_lea.hbm %s2794_s26, 256  ;;  %s2260_s19 = scalar_lea.hbm %s2851_s9, 512 }
 0xd6c   : > { %p2257_p6 = scmp.ne.s32.totalorder %s2794_s26, %s2256_s25  ;;  %p2261_p10 = scmp.lt.u32.totalorder %s2794_s26, %s2851_s9 }
 0xd6d   : > { %p2262_p11 = scmp.lt.u32.totalorder %s2260_s19, %s2256_s25  ;;  %p2264_p13 = scmp.lt.u32.totalorder %s2256_s25, %s2794_s26 }
 0xd6e   : > { %p2258_p7 = pnand %p2257_p6, %p2426_p4 }
 0xd6f   : > { %p2263_p12 = por %p2262_p11, %p2261_p10 }
 0xd70   : > { %p2259_p9 = pneg %p2258_p7 }
 0xd71   : > { %p2265_p0 = por %p2264_p13, %p2263_p12 }
 0xd73   : > { %p2266_p1 = pnand %p2265_p0, %p2259_p9 }
 0xd75   : > { %2269 = shalt.err (!%p2266_p1)
}
 0xd76   : > { %s2331_s28 = smov 128   ;;  %s2332_s14 = smov 8  }
 0xd77   : > { %2163 = dma.vmem_to_hbm [thread:$0]  (%p2426_p4), %s2789_s17, 256, %s2794_s26, %s2796_s27, %s2331_s28, %s2331_s28, %s2332_s14  }
 0xd78 PF: > { %p2169_p2 = scmp.ge.s32.totalorder %s2320_s16, 2  ;;  %s1816_s29 = sand.u32 1, %s2300_s11  }
 0xd79   : > { %s1817_s30 = scalar_lea.sflag [#allocation4], %s1816_s29 }
 0xd7a   : > { %p2166_p3 = pnand %p2169_p2, %p2433_p8 }
 0xd7c   : > { %2295 = dma.done.wait (!%p2166_p3), %s1817_s30, 256  }
 0xd7d   : > { %2297 = vsyncadd (!%p2166_p3), %s1817_s30, 4294967040  ;;  %s24_s16 = sadd.s32 1, %s2320_s16   ;;  %s2863_s11 = smov %s2304_s12 }
 0xd7e   : > { %p21_p5 = scmp.ge.s32.totalorder %s24_s16, 4   ;;  %s2864_s12 = smov %s2308_s13 }
 0xd7f   : > { %s2865_s13 = smov %s2439_s23  ;;  %s2866_s14 = smov %s2316_s15 }
 0xd80   : > { %s2867_s15 = smov %s2869_s18  ;;  %23 = sbr.rel (!%p21_p5) target bundleno = 7 (0x7), region = 97 }
 0xd87   :  { %1822 = vsyncpa [#allocation4], 1 }
 0xd88   :  { %1824 = vsyncpa [#allocation4 + $0x1], 1 }

</bundles_post_ra>
